<compile_context>
chip_gen: v7x
topology: tpu7x:2x2x1
jax: 0.10.0
libtpu: 0.0.40
codegen_flags: <defaults>
</compile_context>

<pallas_src>
import functools
import math

import jax
import jax.numpy as jnp
from jax.experimental import pallas as pl
from jax.experimental.pallas import tpu as pltpu

BN_EPS = 1e-5
INTERP_EPS = 1e-8


def _round_up(x, m):
    return (x + m - 1) // m * m


def _vmem_capacity_bytes():
    """Per-core VMEM capacity in bytes; conservative (v7x) fallback."""
    try:
        return int(pltpu.get_tpu_info().vmem_capacity_bytes)
    except Exception:
        return 64 * 1024 * 1024


def _resident_spec(block_shape, index_map):
    """Single-buffered BlockSpec for blocks resident across the inner grid
    axis (index_map constant over n): halves their VMEM footprint.  Falls back
    to the default double-buffered spec if pipeline_mode / Buffered is not
    available in the running JAX version."""
    try:
        return pl.BlockSpec(block_shape, index_map,
                            pipeline_mode=pl.Buffered(1))
    except Exception:
        return pl.BlockSpec(block_shape, index_map)


# ---------------------------------------------------------------------------
# Pass 1: global train-mode BatchNorm statistics of u = x @ W (bias cancels).
# Rows are split 2-ways on a leading "parallel" axis (megacore on v7x); each
# half accumulates into its own (1, 1, d) partial, summed in the wrapper.
# ---------------------------------------------------------------------------
def _linear_stats_kernel(x_ref, w_ref, sum_ref, sq_ref):
    @pl.when(pl.program_id(1) == 0)
    def _init():
        sum_ref[...] = jnp.zeros_like(sum_ref)
        sq_ref[...] = jnp.zeros_like(sq_ref)

    u = jnp.dot(x_ref[...], w_ref[...], preferred_element_type=jnp.float32)
    sum_ref[0] += jnp.sum(u, axis=0, keepdims=True)
    sq_ref[0] += jnp.sum(u * u, axis=0, keepdims=True)


def _linear_stats(x_flat, w, tile_m):
    m, c_in = x_flat.shape
    d = w.shape[1]
    tm = min(tile_m, _round_up(m, 8))
    m_pad = _round_up(m, 2 * tm)        # 2-way row split for megacore
    if m_pad != m:                      # zero rows contribute 0 to both sums
        x_flat = jnp.pad(x_flat, ((0, m_pad - m), (0, 0)))
    steps = m_pad // (2 * tm)
    su, sq = pl.pallas_call(
        _linear_stats_kernel,
        grid=(2, steps),
        in_specs=[pl.BlockSpec((tm, c_in), lambda c, i: (c * steps + i, 0)),
                  pl.BlockSpec((c_in, d), lambda c, i: (0, 0))],
        out_specs=(pl.BlockSpec((1, 1, d), lambda c, i: (c, 0, 0)),
                   pl.BlockSpec((1, 1, d), lambda c, i: (c, 0, 0))),
        out_shape=(jax.ShapeDtypeStruct((2, 1, d), jnp.float32),
                   jax.ShapeDtypeStruct((2, 1, d), jnp.float32)),
        compiler_params=pltpu.CompilerParams(
            dimension_semantics=("parallel", "arbitrary")),
    )(x_flat, w)
    return jnp.sum(su, axis=0), jnp.sum(sq, axis=0)     # (1, d) each


def _fold_bn(su, sq, count, gamma, beta):
    """Fold train-mode BatchNorm into a per-channel affine on u = x @ W."""
    # TODO(synk): at production point counts (>=1e6 rows) consider Welford-
    # style chunked mean/var merging instead of E[u^2]-E[u]^2 in one pass.
    mean_u = su / count
    var = jnp.maximum(sq / count - mean_u * mean_u, 0.0)   # biased variance
    scale = gamma.reshape(1, -1) * jax.lax.rsqrt(var + BN_EPS)
    shift = beta.reshape(1, -1) - mean_u * scale
    return scale, shift


# ---------------------------------------------------------------------------
# Pass 2: coarse branch feats1 = ReLU((points1 @ W1) * scale1 + shift1).
# ---------------------------------------------------------------------------
def _linear_bn_relu_kernel(x_ref, w_ref, scale_ref, shift_ref, o_ref):
    u = jnp.dot(x_ref[...], w_ref[...], preferred_element_type=jnp.float32)
    o_ref[...] = jnp.maximum(u * scale_ref[...] + shift_ref[...], 0.0)


def _linear_bn_relu(x_flat, w, scale, shift, tile_m):
    m, c_in = x_flat.shape
    d = w.shape[1]
    tm = min(tile_m, _round_up(m, 8))
    m_pad = _round_up(m, tm)
    if m_pad != m:
        x_flat = jnp.pad(x_flat, ((0, m_pad - m), (0, 0)))
    out = pl.pallas_call(
        _linear_bn_relu_kernel,
        grid=(m_pad // tm,),
        in_specs=[pl.BlockSpec((tm, c_in), lambda i: (i, 0)),
                  pl.BlockSpec((c_in, d), lambda i: (0, 0)),
                  pl.BlockSpec((1, d), lambda i: (0, 0)),
                  pl.BlockSpec((1, d), lambda i: (0, 0))],
        out_specs=pl.BlockSpec((tm, d), lambda i: (i, 0)),
        out_shape=jax.ShapeDtypeStruct((m_pad, d), jnp.float32),
        compiler_params=pltpu.CompilerParams(
            dimension_semantics=("parallel",)),
    )(x_flat, w, scale, shift)
    return out[:m]


# ---------------------------------------------------------------------------
# Pass 3: fused fine branch + 3-NN interpolation + add, tiled over (B, N).
# ---------------------------------------------------------------------------
def _interp_add_kernel(idx_bits, xyz1_ref, feats1_ref, xyz2_ref, p2_ref,
                       w2_ref, scale2_ref, shift2_ref, out_ref):
    tn = xyz2_ref.shape[1]      # fine points in this tile
    s = xyz1_ref.shape[2]       # coarse points (whole set, resident)

    # fine branch: Linear + folded BatchNorm + ReLU on this tile (MXU)
    u2 = jnp.dot(p2_ref[0], w2_ref[...], preferred_element_type=jnp.float32)
    feats2 = jnp.maximum(u2 * scale2_ref[...] + shift2_ref[...], 0.0)

    # exact squared distances fine-tile -> coarse (per-coordinate form avoids
    # the |x|^2 + |y|^2 - 2xy catastrophic cancellation).  No zeros-init: the
    # first coordinate seeds the accumulator.
    diff = xyz2_ref[0, :, 0:1] - xyz1_ref[0, 0:1, :]        # (tn,1)-(1,s)
    d = diff * diff
    for c in range(1, 3):
        diff = xyz2_ref[0, :, c:c + 1] - xyz1_ref[0, c:c + 1, :]
        d = d + diff * diff

    # 3-NN selection with a single fused value+index min per round: d >= 0 so
    # its int32 bit pattern is order-preserving; the lane index sits in the
    # low `idx_bits` bits (identifier / tie-break only).  The IDW weight uses
    # the EXACT selected distance, extracted through the one-hot mask, so the
    # reciprocal is paid on (tn, 1) per round instead of the full (tn, s).
    lane = jax.lax.broadcasted_iota(jnp.int32, (tn, s), 1)
    key = (pltpu.bitcast(d, jnp.int32) & jnp.int32(-(1 << idx_bits))) | lane
    int_max = jnp.int32(jnp.iinfo(jnp.int32).max)
    w = None
    for _ in range(3):
        kmin = jnp.min(key, axis=-1, keepdims=True)
        hit = key == kmin                    # exact one-hot (keys distinct)
        dsel = jnp.sum(jnp.where(hit, d, 0.0), axis=-1, keepdims=True)
        rsel = 1.0 / (dsel + jnp.float32(INTERP_EPS))       # (tn, 1) divide
        prev = jnp.float32(0.0) if w is None else w
        w = jnp.where(hit, rsel, prev)       # unnormalized IDW weight
        key = jnp.where(hit, int_max, key)   # knock out for the next round
    wsum = jnp.sum(w, axis=-1, keepdims=True)

    # sparse-weight gather as an MXU matmul, per-point normalization, add
    interp = jnp.dot(w, feats1_ref[0], preferred_element_type=jnp.float32)
    out_ref[0] = (interp * (1.0 / wsum) + feats2).astype(out_ref.dtype)


def _plan_pass3(S, dim2, dim_out, n, tile_n):
    """Generation-aware tile / VMEM planning for the fused interpolation pass.

    Per-tile VMEM is dominated by the (tn, S) temporaries (d, key, w, hit,
    diff) plus double-buffered fine tiles, with the coarse xyz/feats1 blocks
    resident (single-buffered).  128 MiB parts (v5e/v6e): ~96 MiB scoped
    limit, tiles up to 512 rows.  64 MiB parts (v7x): ~40 MiB scoped limit,
    tiles up to 256 rows, shrinking further with large S.
    """
    vmem = _vmem_capacity_bytes()
    big = vmem >= 100 * 1024 * 1024
    vmem_limit = (96 if big else 40) * 1024 * 1024
    cap = 512 if big else 256
    if tile_n is None:
        resident = 4 * (3 * S + S * dim_out + dim2 * dim_out + 2 * dim_out)
        per_row = 4 * (2 * (3 + dim2 + dim_out)   # double-buffered fine tiles
                       + 6 * S                    # (tn, S) temporaries
                       + 2 * dim_out)             # u2 / feats2
        budget = int(vmem_limit * 0.85) - resident
        tn = budget // max(per_row, 1)
        tn = max(8, min(cap, (tn // 8) * 8))
    else:
        tn = tile_n
    tn = min(tn, _round_up(n, 8))
    return tn, vmem_limit


def transition_up(xyz1, points1, xyz2, points2, params, *,
                  tile_n=None, tile_m=1024):
    """TransitionUp forward.

    xyz1/points1: coarse set (B, S, 3) / (B, S, dim1)
    xyz2/points2: fine   set (B, N, 3) / (B, N, dim2)
    returns (B, N, dim_out)
    """
    B, S, _ = xyz1.shape
    _, N, _ = xyz2.shape
    dim1 = points1.shape[-1]
    dim2 = points2.shape[-1]
    dim_out = params['w1'].shape[-1]
    assert S >= 3, "3-NN interpolation needs at least 3 coarse points"

    # Pass 1: exact global BN statistics (tiling-safe; Linear bias cancels).
    p1_flat = points1.reshape(B * S, dim1)
    p2_flat = points2.reshape(B * N, dim2)
    su1, sq1 = _linear_stats(p1_flat, params['w1'], tile_m)
    su2, sq2 = _linear_stats(p2_flat, params['w2'], tile_m)
    scale1, shift1 = _fold_bn(su1, sq1, B * S, params['g1'], params['beta1'])
    scale2, shift2 = _fold_bn(su2, sq2, B * N, params['g2'], params['beta2'])

    # Pass 2: feats1 on the small coarse set (kept resident per batch below).
    feats1 = _linear_bn_relu(p1_flat, params['w1'], scale1, shift1, tile_m)
    feats1 = feats1.reshape(B, S, dim_out)

    # Pass 3: fine set tiled over N.  Coarse coords go coords-major so the
    # kernel reads (1, S) rows without any in-kernel transpose.
    tn, vmem_limit = _plan_pass3(S, dim2, dim_out, N, tile_n)
    n_pad = _round_up(N, tn)
    xyz2_p, p2_p = xyz2, points2
    if n_pad != N:
        xyz2_p = jnp.pad(xyz2, ((0, 0), (0, n_pad - N), (0, 0)))
        p2_p = jnp.pad(points2, ((0, 0), (0, n_pad - N), (0, 0)))
    xyz1_t = jnp.transpose(xyz1, (0, 2, 1))            # (B, 3, S)

    idx_bits = max(1, (S - 1).bit_length())
    kernel = functools.partial(_interp_add_kernel, idx_bits)

    flops = (2 * B * n_pad * dim2 * dim_out            # fc2 matmul
             + 2 * B * n_pad * S * dim_out             # interpolation matmul
             + 12 * B * n_pad * S)                     # distances + 3-NN select
    bytes_accessed = 4 * (xyz1_t.size + feats1.size + xyz2_p.size + p2_p.size
                          + params['w2'].size + 2 * dim_out
                          + B * n_pad * dim_out)
    cost = pl.CostEstimate(flops=flops, transcendentals=4 * B * n_pad,
                           bytes_accessed=bytes_accessed)

    out = pl.pallas_call(
        kernel,
        grid=(B, n_pad // tn),
        in_specs=[
            _resident_spec((1, 3, S), lambda b, n: (b, 0, 0)),        # coarse xyz, resident per b
            _resident_spec((1, S, dim_out), lambda b, n: (b, 0, 0)),  # feats1, resident per b
            pl.BlockSpec((1, tn, 3), lambda b, n: (b, n, 0)),         # fine xyz tile
            pl.BlockSpec((1, tn, dim2), lambda b, n: (b, n, 0)),      # fine feature tile
            _resident_spec((dim2, dim_out), lambda b, n: (0, 0)),     # W2 (2-D, shared)
            _resident_spec((1, dim_out), lambda b, n: (0, 0)),        # folded BN scale2
            _resident_spec((1, dim_out), lambda b, n: (0, 0)),        # folded BN shift2
        ],
        out_specs=pl.BlockSpec((1, tn, dim_out), lambda b, n: (b, n, 0)),
        out_shape=jax.ShapeDtypeStruct((B, n_pad, dim_out), jnp.float32),
        compiler_params=pltpu.CompilerParams(
            dimension_semantics=("parallel", "parallel"),   # megacore on v7x
            vmem_limit_bytes=vmem_limit),
        cost_estimate=cost,
    )(xyz1_t, feats1, xyz2_p, p2_p, params['w2'], scale2, shift2)

    return out[:, :N, :]


def reference(xyz1, points1, xyz2, points2, p):
    """Pure-JAX mirror of the PyTorch forward (for the correctness check)."""
    def bn_relu(z, g, b):
        m = z.mean(axis=(0, 1), keepdims=True)
        v = ((z - m) ** 2).mean(axis=(0, 1), keepdims=True)
        return jnp.maximum(g * (z - m) / jnp.sqrt(v + BN_EPS) + b, 0.0)

    feats1 = bn_relu(points1 @ p['w1'] + p['b1'], p['g1'], p['beta1'])
    feats2 = bn_relu(points2 @ p['w2'] + p['b2'], p['g2'], p['beta2'])

    d = jnp.sum((xyz2[:, :, None, :] - xyz1[:, None, :, :]) ** 2, axis=-1)
    idx = jnp.argsort(d, axis=-1)[..., :3]                       # (B, N, 3)
    dd = jnp.take_along_axis(d, idx, axis=-1)
    recip = 1.0 / (dd + INTERP_EPS)
    wgt = recip / jnp.sum(recip, axis=-1, keepdims=True)
    Bsz = xyz1.shape[0]
    gathered = feats1[jnp.arange(Bsz)[:, None, None], idx]       # (B, N, 3, D)
    interp = jnp.sum(gathered * wgt[..., None], axis=2)
    return interp + feats2


def _make_case(key, B, S, N, dim1, dim2, dim_out):
    k = jax.random.split(key, 10)
    xyz1 = jax.random.uniform(k[0], (B, S, 3), dtype=jnp.float32)
    points1 = jax.random.normal(k[1], (B, S, dim1), dtype=jnp.float32)
    xyz2 = jax.random.uniform(k[2], (B, N, 3), dtype=jnp.float32)
    points2 = jax.random.normal(k[3], (B, N, dim2), dtype=jnp.float32)
    bnd1 = 1.0 / math.sqrt(dim1)
    bnd2 = 1.0 / math.sqrt(dim2)
    params = {
        'w1': jax.random.uniform(k[4], (dim1, dim_out), jnp.float32, -bnd1, bnd1),
        'b1': jax.random.uniform(k[5], (dim_out,), jnp.float32, -bnd1, bnd1),
        'g1': jax.random.uniform(k[8], (dim_out,), jnp.float32, 0.5, 1.5),
        'beta1': 0.1 * jax.random.normal(k[9], (dim_out,), jnp.float32),
        'w2': jax.random.uniform(k[6], (dim2, dim_out), jnp.float32, -bnd2, bnd2),
        'b2': jax.random.uniform(k[7], (dim_out,), jnp.float32, -bnd2, bnd2),
        'g2': jax.random.uniform(k[9], (dim_out,), jnp.float32, 0.5, 1.5),
        'beta2': 0.1 * jax.random.normal(k[8], (dim_out,), jnp.float32),
    }
    return xyz1, points1, xyz2, points2, params


if __name__ == "__main__":
    key = jax.random.PRNGKey(0)
    k_a, k_b = jax.random.split(key)

    # Case A: small shapes, auto tile planning, N not a tile multiple.
    B, S, N = 2, 8, 20
    dim1, dim2, dim_out = 32, 16, 32
    xyz1, points1, xyz2, points2, params = _make_case(k_a, B, S, N,
                                                      dim1, dim2, dim_out)
    out = jax.jit(transition_up)(xyz1, points1, xyz2, points2, params)
    out = jax.block_until_ready(out)
    ref = reference(xyz1, points1, xyz2, points2, params)
    assert out.shape == (B, N, dim_out)
    assert jnp.allclose(out, ref, atol=1e-3, rtol=1e-3), "mismatch vs reference (A)"

    # Case B: multiple N tiles with padding (explicit tile_n), different dims.
    B, S, N = 2, 16, 300
    dim1, dim2, dim_out = 24, 16, 48
    xyz1, points1, xyz2, points2, params = _make_case(k_b, B, S, N,
                                                      dim1, dim2, dim_out)
    out = jax.jit(functools.partial(transition_up, tile_n=64))(
        xyz1, points1, xyz2, points2, params)
    out = jax.block_until_ready(out)
    ref = reference(xyz1, points1, xyz2, points2, params)
    assert out.shape == (B, N, dim_out)
    assert jnp.allclose(out, ref, atol=1e-3, rtol=1e-3), "mismatch vs reference (B)"

    print("KERNEL_OK")
</pallas_src>

<mosaic_0001>
module attributes {stable_mosaic.version = 11 : i64} {
  func.func @_linear_stats_kernel(%arg0: i32, %arg1: i32, %arg2: memref<16x32xf32, #tpu.memory_space<vmem>>, %arg3: memref<32x32xf32, #tpu.memory_space<vmem>>, %arg4: memref<1x1x32xf32, #tpu.memory_space<vmem>>, %arg5: memref<1x1x32xf32, #tpu.memory_space<vmem>>) attributes {dimension_semantics = [#tpu.dimension_semantics<parallel>, #tpu.dimension_semantics<arbitrary>], iteration_bounds = array<i64: 2, 1>, scalar_prefetch = 0 : i64, scratch_operands = 0 : i64, tpu.core_type = #tpu.core_type<tc>, window_params = [{transform_indices = @transform_0, window_bounds = array<i64: 16, 32>}, {pipeline_mode = #tpu.pipeline_mode<synchronous>, transform_indices = @transform_1, window_bounds = array<i64: 32, 32>}, {transform_indices = @transform_2, window_bounds = array<i64: 1, 1, 32>}, {transform_indices = @transform_3, window_bounds = array<i64: 1, 1, 32>}]} {
    %c0_i32 = arith.constant 0 : i32
    %0 = arith.cmpi eq, %arg1, %c0_i32 : i32
    %1 = arith.extui %0 : i1 to i32
    %c0_i32_0 = arith.constant 0 : i32
    %2 = arith.cmpi ne, %1, %c0_i32_0 : i32
    scf.if %2 {
      %cst_18 = arith.constant 0.000000e+00 : f32
      %23 = vector.broadcast %cst_18 : f32 to vector<1x1x32xf32>
      %c0_19 = arith.constant 0 : index
      %c0_20 = arith.constant 0 : index
      %c0_21 = arith.constant 0 : index
      %24 = vector.load %arg4[%c0_19, %c0_20, %c0_21] : memref<1x1x32xf32, #tpu.memory_space<vmem>>, vector<1x1x32xf32>
      tpu.vector_store %arg4[%c0_19, %c0_20, %c0_21], %23 {strides = array<i32>} : memref<1x1x32xf32, #tpu.memory_space<vmem>>, vector<1x1x32xf32>,
      %cst_22 = arith.constant 0.000000e+00 : f32
      %25 = vector.broadcast %cst_22 : f32 to vector<1x1x32xf32>
      %c0_23 = arith.constant 0 : index
      %c0_24 = arith.constant 0 : index
      %c0_25 = arith.constant 0 : index
      %26 = vector.load %arg5[%c0_23, %c0_24, %c0_25] : memref<1x1x32xf32, #tpu.memory_space<vmem>>, vector<1x1x32xf32>
      tpu.vector_store %arg5[%c0_23, %c0_24, %c0_25], %25 {strides = array<i32>} : memref<1x1x32xf32, #tpu.memory_space<vmem>>, vector<1x1x32xf32>,
    } else {
    }
    %c0 = arith.constant 0 : index
    %c0_1 = arith.constant 0 : index
    %3 = vector.load %arg2[%c0, %c0_1] : memref<16x32xf32, #tpu.memory_space<vmem>>, vector<16x32xf32>
    %c0_2 = arith.constant 0 : index
    %c0_3 = arith.constant 0 : index
    %4 = vector.load %arg3[%c0_2, %c0_3] : memref<32x32xf32, #tpu.memory_space<vmem>>, vector<32x32xf32>
    %cst = arith.constant dense<0.000000e+00> : vector<16x32xf32>
    %5 = tpu.matmul %3, %4, %cst {dimension_numbers = #tpu.dot_dimension_numbers<[1], [0], [0], [1], [0, 0, 1, 1], [], []>} : vector<16x32xf32>, vector<32x32xf32>, vector<16x32xf32> -> vector<16x32xf32>
    %c0_4 = arith.constant 0 : index
    %c0_5 = arith.constant 0 : index
    %c0_6 = arith.constant 0 : index
    %6 = vector.load %arg4[%c0_4, %c0_5, %c0_6] : memref<1x1x32xf32, #tpu.memory_space<vmem>>, vector<1x1x32xf32>
    %7 = vector.shape_cast %6 : vector<1x1x32xf32> to vector<1x32xf32>
    %cst_7 = arith.constant dense<0.000000e+00> : vector<32xf32>
    %8 = vector.multi_reduction <add>, %5, %cst_7 [0] : vector<16x32xf32> to vector<32xf32>
    %9 = vector.shape_cast %8 : vector<32xf32> to vector<1x32xf32>
    %10 = arith.addf %7, %9 : vector<1x32xf32>
    %c0_8 = arith.constant 0 : index
    %c0_9 = arith.constant 0 : index
    %c0_10 = arith.constant 0 : index
    %11 = vector.load %arg4[%c0_8, %c0_9, %c0_10] : memref<1x1x32xf32, #tpu.memory_space<vmem>>, vector<1x1x32xf32>
    %12 = vector.shape_cast %11 : vector<1x1x32xf32> to vector<1x32xf32>
    %13 = vector.shape_cast %10 : vector<1x32xf32> to vector<1x1x32xf32>
    tpu.vector_store %arg4[%c0_8, %c0_9, %c0_10], %13 {strides = array<i32>} : memref<1x1x32xf32, #tpu.memory_space<vmem>>, vector<1x1x32xf32>,
    %c0_11 = arith.constant 0 : index
    %c0_12 = arith.constant 0 : index
    %c0_13 = arith.constant 0 : index
    %14 = vector.load %arg5[%c0_11, %c0_12, %c0_13] : memref<1x1x32xf32, #tpu.memory_space<vmem>>, vector<1x1x32xf32>
    %15 = vector.shape_cast %14 : vector<1x1x32xf32> to vector<1x32xf32>
    %16 = arith.mulf %5, %5 : vector<16x32xf32>
    %cst_14 = arith.constant dense<0.000000e+00> : vector<32xf32>
    %17 = vector.multi_reduction <add>, %16, %cst_14 [0] : vector<16x32xf32> to vector<32xf32>
    %18 = vector.shape_cast %17 : vector<32xf32> to vector<1x32xf32>
    %19 = arith.addf %15, %18 : vector<1x32xf32>
    %c0_15 = arith.constant 0 : index
    %c0_16 = arith.constant 0 : index
    %c0_17 = arith.constant 0 : index
    %20 = vector.load %arg5[%c0_15, %c0_16, %c0_17] : memref<1x1x32xf32, #tpu.memory_space<vmem>>, vector<1x1x32xf32>
    %21 = vector.shape_cast %20 : vector<1x1x32xf32> to vector<1x32xf32>
    %22 = vector.shape_cast %19 : vector<1x32xf32> to vector<1x1x32xf32>
    tpu.vector_store %arg5[%c0_15, %c0_16, %c0_17], %22 {strides = array<i32>} : memref<1x1x32xf32, #tpu.memory_space<vmem>>, vector<1x1x32xf32>,
    return
  }
  func.func @transform_0(%arg0: i32, %arg1: i32) -> (i32, i32) {
    %c1_i32 = arith.constant 1 : i32
    %0 = arith.muli %arg0, %c1_i32 : i32
    %1 = arith.addi %0, %arg1 : i32
    %c0_i32 = arith.constant 0 : i32
    %c0_i32_0 = arith.constant 0 : i32
    return %1, %c0_i32 : i32, i32
  }
  func.func @transform_1(%arg0: i32, %arg1: i32) -> (i32, i32) {
    %c0_i32 = arith.constant 0 : i32
    %c0_i32_0 = arith.constant 0 : i32
    %c0_i32_1 = arith.constant 0 : i32
    return %c0_i32, %c0_i32_0 : i32, i32
  }
  func.func @transform_2(%arg0: i32, %arg1: i32) -> (i32, i32, i32) {
    %c0_i32 = arith.constant 0 : i32
    %c0_i32_0 = arith.constant 0 : i32
    %c0_i32_1 = arith.constant 0 : i32
    return %arg0, %c0_i32, %c0_i32_0 : i32, i32, i32
  }
  func.func @transform_3(%arg0: i32, %arg1: i32) -> (i32, i32, i32) {
    %c0_i32 = arith.constant 0 : i32
    %c0_i32_0 = arith.constant 0 : i32
    %c0_i32_1 = arith.constant 0 : i32
    return %arg0, %c0_i32, %c0_i32_0 : i32, i32, i32
  }
}

module attributes {stable_mosaic.version = 11 : i64} {
  func.func @_linear_stats_kernel(%arg0: i32, %arg1: i32, %arg2: memref<40x16xf32, #tpu.memory_space<vmem>>, %arg3: memref<16x32xf32, #tpu.memory_space<vmem>>, %arg4: memref<1x1x32xf32, #tpu.memory_space<vmem>>, %arg5: memref<1x1x32xf32, #tpu.memory_space<vmem>>) attributes {dimension_semantics = [#tpu.dimension_semantics<parallel>, #tpu.dimension_semantics<arbitrary>], iteration_bounds = array<i64: 2, 1>, scalar_prefetch = 0 : i64, scratch_operands = 0 : i64, tpu.core_type = #tpu.core_type<tc>, window_params = [{transform_indices = @transform_0, window_bounds = array<i64: 40, 16>}, {pipeline_mode = #tpu.pipeline_mode<synchronous>, transform_indices = @transform_1, window_bounds = array<i64: 16, 32>}, {transform_indices = @transform_2, window_bounds = array<i64: 1, 1, 32>}, {transform_indices = @transform_3, window_bounds = array<i64: 1, 1, 32>}]} {
    %c0_i32 = arith.constant 0 : i32
    %0 = arith.cmpi eq, %arg1, %c0_i32 : i32
    %1 = arith.extui %0 : i1 to i32
    %c0_i32_0 = arith.constant 0 : i32
    %2 = arith.cmpi ne, %1, %c0_i32_0 : i32
    scf.if %2 {
      %cst_18 = arith.constant 0.000000e+00 : f32
      %23 = vector.broadcast %cst_18 : f32 to vector<1x1x32xf32>
      %c0_19 = arith.constant 0 : index
      %c0_20 = arith.constant 0 : index
      %c0_21 = arith.constant 0 : index
      %24 = vector.load %arg4[%c0_19, %c0_20, %c0_21] : memref<1x1x32xf32, #tpu.memory_space<vmem>>, vector<1x1x32xf32>
      tpu.vector_store %arg4[%c0_19, %c0_20, %c0_21], %23 {strides = array<i32>} : memref<1x1x32xf32, #tpu.memory_space<vmem>>, vector<1x1x32xf32>,
      %cst_22 = arith.constant 0.000000e+00 : f32
      %25 = vector.broadcast %cst_22 : f32 to vector<1x1x32xf32>
      %c0_23 = arith.constant 0 : index
      %c0_24 = arith.constant 0 : index
      %c0_25 = arith.constant 0 : index
      %26 = vector.load %arg5[%c0_23, %c0_24, %c0_25] : memref<1x1x32xf32, #tpu.memory_space<vmem>>, vector<1x1x32xf32>
      tpu.vector_store %arg5[%c0_23, %c0_24, %c0_25], %25 {strides = array<i32>} : memref<1x1x32xf32, #tpu.memory_space<vmem>>, vector<1x1x32xf32>,
    } else {
    }
    %c0 = arith.constant 0 : index
    %c0_1 = arith.constant 0 : index
    %3 = vector.load %arg2[%c0, %c0_1] : memref<40x16xf32, #tpu.memory_space<vmem>>, vector<40x16xf32>
    %c0_2 = arith.constant 0 : index
    %c0_3 = arith.constant 0 : index
    %4 = vector.load %arg3[%c0_2, %c0_3] : memref<16x32xf32, #tpu.memory_space<vmem>>, vector<16x32xf32>
    %cst = arith.constant dense<0.000000e+00> : vector<40x32xf32>
    %5 = tpu.matmul %3, %4, %cst {dimension_numbers = #tpu.dot_dimension_numbers<[1], [0], [0], [1], [0, 0, 1, 1], [], []>} : vector<40x16xf32>, vector<16x32xf32>, vector<40x32xf32> -> vector<40x32xf32>
    %c0_4 = arith.constant 0 : index
    %c0_5 = arith.constant 0 : index
    %c0_6 = arith.constant 0 : index
    %6 = vector.load %arg4[%c0_4, %c0_5, %c0_6] : memref<1x1x32xf32, #tpu.memory_space<vmem>>, vector<1x1x32xf32>
    %7 = vector.shape_cast %6 : vector<1x1x32xf32> to vector<1x32xf32>
    %cst_7 = arith.constant dense<0.000000e+00> : vector<32xf32>
    %8 = vector.multi_reduction <add>, %5, %cst_7 [0] : vector<40x32xf32> to vector<32xf32>
    %9 = vector.shape_cast %8 : vector<32xf32> to vector<1x32xf32>
    %10 = arith.addf %7, %9 : vector<1x32xf32>
    %c0_8 = arith.constant 0 : index
    %c0_9 = arith.constant 0 : index
    %c0_10 = arith.constant 0 : index
    %11 = vector.load %arg4[%c0_8, %c0_9, %c0_10] : memref<1x1x32xf32, #tpu.memory_space<vmem>>, vector<1x1x32xf32>
    %12 = vector.shape_cast %11 : vector<1x1x32xf32> to vector<1x32xf32>
    %13 = vector.shape_cast %10 : vector<1x32xf32> to vector<1x1x32xf32>
    tpu.vector_store %arg4[%c0_8, %c0_9, %c0_10], %13 {strides = array<i32>} : memref<1x1x32xf32, #tpu.memory_space<vmem>>, vector<1x1x32xf32>,
    %c0_11 = arith.constant 0 : index
    %c0_12 = arith.constant 0 : index
    %c0_13 = arith.constant 0 : index
    %14 = vector.load %arg5[%c0_11, %c0_12, %c0_13] : memref<1x1x32xf32, #tpu.memory_space<vmem>>, vector<1x1x32xf32>
    %15 = vector.shape_cast %14 : vector<1x1x32xf32> to vector<1x32xf32>
    %16 = arith.mulf %5, %5 : vector<40x32xf32>
    %cst_14 = arith.constant dense<0.000000e+00> : vector<32xf32>
    %17 = vector.multi_reduction <add>, %16, %cst_14 [0] : vector<40x32xf32> to vector<32xf32>
    %18 = vector.shape_cast %17 : vector<32xf32> to vector<1x32xf32>
    %19 = arith.addf %15, %18 : vector<1x32xf32>
    %c0_15 = arith.constant 0 : index
    %c0_16 = arith.constant 0 : index
    %c0_17 = arith.constant 0 : index
    %20 = vector.load %arg5[%c0_15, %c0_16, %c0_17] : memref<1x1x32xf32, #tpu.memory_space<vmem>>, vector<1x1x32xf32>
    %21 = vector.shape_cast %20 : vector<1x1x32xf32> to vector<1x32xf32>
    %22 = vector.shape_cast %19 : vector<1x32xf32> to vector<1x1x32xf32>
    tpu.vector_store %arg5[%c0_15, %c0_16, %c0_17], %22 {strides = array<i32>} : memref<1x1x32xf32, #tpu.memory_space<vmem>>, vector<1x1x32xf32>,
    return
  }
  func.func @transform_0(%arg0: i32, %arg1: i32) -> (i32, i32) {
    %c1_i32 = arith.constant 1 : i32
    %0 = arith.muli %arg0, %c1_i32 : i32
    %1 = arith.addi %0, %arg1 : i32
    %c0_i32 = arith.constant 0 : i32
    %c0_i32_0 = arith.constant 0 : i32
    return %1, %c0_i32 : i32, i32
  }
  func.func @transform_1(%arg0: i32, %arg1: i32) -> (i32, i32) {
    %c0_i32 = arith.constant 0 : i32
    %c0_i32_0 = arith.constant 0 : i32
    %c0_i32_1 = arith.constant 0 : i32
    return %c0_i32, %c0_i32_0 : i32, i32
  }
  func.func @transform_2(%arg0: i32, %arg1: i32) -> (i32, i32, i32) {
    %c0_i32 = arith.constant 0 : i32
    %c0_i32_0 = arith.constant 0 : i32
    %c0_i32_1 = arith.constant 0 : i32
    return %arg0, %c0_i32, %c0_i32_0 : i32, i32, i32
  }
  func.func @transform_3(%arg0: i32, %arg1: i32) -> (i32, i32, i32) {
    %c0_i32 = arith.constant 0 : i32
    %c0_i32_0 = arith.constant 0 : i32
    %c0_i32_1 = arith.constant 0 : i32
    return %arg0, %c0_i32, %c0_i32_0 : i32, i32, i32
  }
}

module attributes {stable_mosaic.version = 11 : i64} {
  func.func @_linear_bn_relu_kernel(%arg0: i32, %arg1: memref<16x32xf32, #tpu.memory_space<vmem>>, %arg2: memref<32x32xf32, #tpu.memory_space<vmem>>, %arg3: memref<1x32xf32, #tpu.memory_space<vmem>>, %arg4: memref<1x32xf32, #tpu.memory_space<vmem>>, %arg5: memref<16x32xf32, #tpu.memory_space<vmem>>) attributes {dimension_semantics = [#tpu.dimension_semantics<parallel>], iteration_bounds = array<i64: 1>, scalar_prefetch = 0 : i64, scratch_operands = 0 : i64, tpu.core_type = #tpu.core_type<tc>, window_params = [{transform_indices = @transform_0, window_bounds = array<i64: 16, 32>}, {pipeline_mode = #tpu.pipeline_mode<synchronous>, transform_indices = @transform_1, window_bounds = array<i64: 32, 32>}, {pipeline_mode = #tpu.pipeline_mode<synchronous>, transform_indices = @transform_2, window_bounds = array<i64: 1, 32>}, {pipeline_mode = #tpu.pipeline_mode<synchronous>, transform_indices = @transform_3, window_bounds = array<i64: 1, 32>}, {transform_indices = @transform_4, window_bounds = array<i64: 16, 32>}]} {
    %c0 = arith.constant 0 : index
    %c0_0 = arith.constant 0 : index
    %0 = vector.load %arg1[%c0, %c0_0] : memref<16x32xf32, #tpu.memory_space<vmem>>, vector<16x32xf32>
    %c0_1 = arith.constant 0 : index
    %c0_2 = arith.constant 0 : index
    %1 = vector.load %arg2[%c0_1, %c0_2] : memref<32x32xf32, #tpu.memory_space<vmem>>, vector<32x32xf32>
    %cst = arith.constant dense<0.000000e+00> : vector<16x32xf32>
    %2 = tpu.matmul %0, %1, %cst {dimension_numbers = #tpu.dot_dimension_numbers<[1], [0], [0], [1], [0, 0, 1, 1], [], []>} : vector<16x32xf32>, vector<32x32xf32>, vector<16x32xf32> -> vector<16x32xf32>
    %c0_3 = arith.constant 0 : index
    %c0_4 = arith.constant 0 : index
    %3 = vector.load %arg3[%c0_3, %c0_4] : memref<1x32xf32, #tpu.memory_space<vmem>>, vector<1x32xf32>
    %4 = vector.broadcast %3 : vector<1x32xf32> to vector<16x32xf32>
    %5 = arith.mulf %2, %4 : vector<16x32xf32>
    %c0_5 = arith.constant 0 : index
    %c0_6 = arith.constant 0 : index
    %6 = vector.load %arg4[%c0_5, %c0_6] : memref<1x32xf32, #tpu.memory_space<vmem>>, vector<1x32xf32>
    %7 = vector.broadcast %6 : vector<1x32xf32> to vector<16x32xf32>
    %8 = arith.addf %5, %7 : vector<16x32xf32>
    %cst_7 = arith.constant 0.000000e+00 : f32
    %9 = vector.broadcast %cst_7 : f32 to vector<16x32xf32>
    %10 = arith.maximumf %8, %9 : vector<16x32xf32>
    %c0_8 = arith.constant 0 : index
    %c0_9 = arith.constant 0 : index
    %11 = vector.load %arg5[%c0_8, %c0_9] : memref<16x32xf32, #tpu.memory_space<vmem>>, vector<16x32xf32>
    tpu.vector_store %arg5[%c0_8, %c0_9], %10 {strides = array<i32>} : memref<16x32xf32, #tpu.memory_space<vmem>>, vector<16x32xf32>,
    return
  }
  func.func @transform_0(%arg0: i32) -> (i32, i32) {
    %c0_i32 = arith.constant 0 : i32
    %c0_i32_0 = arith.constant 0 : i32
    return %arg0, %c0_i32 : i32, i32
  }
  func.func @transform_1(%arg0: i32) -> (i32, i32) {
    %c0_i32 = arith.constant 0 : i32
    %c0_i32_0 = arith.constant 0 : i32
    %c0_i32_1 = arith.constant 0 : i32
    return %c0_i32, %c0_i32_0 : i32, i32
  }
  func.func @transform_2(%arg0: i32) -> (i32, i32) {
    %c0_i32 = arith.constant 0 : i32
    %c0_i32_0 = arith.constant 0 : i32
    %c0_i32_1 = arith.constant 0 : i32
    return %c0_i32, %c0_i32_0 : i32, i32
  }
  func.func @transform_3(%arg0: i32) -> (i32, i32) {
    %c0_i32 = arith.constant 0 : i32
    %c0_i32_0 = arith.constant 0 : i32
    %c0_i32_1 = arith.constant 0 : i32
    return %c0_i32, %c0_i32_0 : i32, i32
  }
  func.func @transform_4(%arg0: i32) -> (i32, i32) {
    %c0_i32 = arith.constant 0 : i32
    %c0_i32_0 = arith.constant 0 : i32
    return %arg0, %c0_i32 : i32, i32
  }
}

module attributes {stable_mosaic.version = 11 : i64} {
  func.func @_interp_add_kernel(%arg0: i32, %arg1: i32, %arg2: memref<1x3x8xf32, #tpu.memory_space<vmem>>, %arg3: memref<1x8x32xf32, #tpu.memory_space<vmem>>, %arg4: memref<1x24x3xf32, #tpu.memory_space<vmem>>, %arg5: memref<1x24x16xf32, #tpu.memory_space<vmem>>, %arg6: memref<16x32xf32, #tpu.memory_space<vmem>>, %arg7: memref<1x32xf32, #tpu.memory_space<vmem>>, %arg8: memref<1x32xf32, #tpu.memory_space<vmem>>, %arg9: memref<1x24x32xf32, #tpu.memory_space<vmem>>) attributes {dimension_semantics = [#tpu.dimension_semantics<parallel>, #tpu.dimension_semantics<parallel>], iteration_bounds = array<i64: 2, 1>, scalar_prefetch = 0 : i64, scratch_operands = 0 : i64, tpu.core_type = #tpu.core_type<tc>, window_params = [{pipeline_mode = #tpu.pipeline_mode<synchronous>, transform_indices = @transform_0, window_bounds = array<i64: 1, 3, 8>}, {pipeline_mode = #tpu.pipeline_mode<synchronous>, transform_indices = @transform_1, window_bounds = array<i64: 1, 8, 32>}, {transform_indices = @transform_2, window_bounds = array<i64: 1, 24, 3>}, {transform_indices = @transform_3, window_bounds = array<i64: 1, 24, 16>}, {pipeline_mode = #tpu.pipeline_mode<synchronous>, transform_indices = @transform_4, window_bounds = array<i64: 16, 32>}, {pipeline_mode = #tpu.pipeline_mode<synchronous>, transform_indices = @transform_5, window_bounds = array<i64: 1, 32>}, {pipeline_mode = #tpu.pipeline_mode<synchronous>, transform_indices = @transform_6, window_bounds = array<i64: 1, 32>}, {transform_indices = @transform_7, window_bounds = array<i64: 1, 24, 32>}]} {
    %c0 = arith.constant 0 : index
    %c0_0 = arith.constant 0 : index
    %c0_1 = arith.constant 0 : index
    %0 = vector.load %arg5[%c0, %c0_0, %c0_1] : memref<1x24x16xf32, #tpu.memory_space<vmem>>, vector<1x24x16xf32>
    %1 = vector.shape_cast %0 : vector<1x24x16xf32> to vector<24x16xf32>
    %c0_2 = arith.constant 0 : index
    %c0_3 = arith.constant 0 : index
    %2 = vector.load %arg6[%c0_2, %c0_3] : memref<16x32xf32, #tpu.memory_space<vmem>>, vector<16x32xf32>
    %cst = arith.constant dense<0.000000e+00> : vector<24x32xf32>
    %3 = tpu.matmul %1, %2, %cst {dimension_numbers = #tpu.dot_dimension_numbers<[1], [0], [0], [1], [0, 0, 1, 1], [], []>} : vector<24x16xf32>, vector<16x32xf32>, vector<24x32xf32> -> vector<24x32xf32>
    %c0_4 = arith.constant 0 : index
    %c0_5 = arith.constant 0 : index
    %4 = vector.load %arg7[%c0_4, %c0_5] : memref<1x32xf32, #tpu.memory_space<vmem>>, vector<1x32xf32>
    %5 = vector.broadcast %4 : vector<1x32xf32> to vector<24x32xf32>
    %6 = arith.mulf %3, %5 : vector<24x32xf32>
    %c0_6 = arith.constant 0 : index
    %c0_7 = arith.constant 0 : index
    %7 = vector.load %arg8[%c0_6, %c0_7] : memref<1x32xf32, #tpu.memory_space<vmem>>, vector<1x32xf32>
    %8 = vector.broadcast %7 : vector<1x32xf32> to vector<24x32xf32>
    %9 = arith.addf %6, %8 : vector<24x32xf32>
    %cst_8 = arith.constant 0.000000e+00 : f32
    %10 = vector.broadcast %cst_8 : f32 to vector<24x32xf32>
    %11 = arith.maximumf %9, %10 : vector<24x32xf32>
    %c0_9 = arith.constant 0 : index
    %c0_10 = arith.constant 0 : index
    %c0_11 = arith.constant 0 : index
    %12 = vector.load %arg4[%c0_9, %c0_10, %c0_11] : memref<1x24x3xf32, #tpu.memory_space<vmem>>, vector<1x24x1xf32>
    %13 = vector.shape_cast %12 : vector<1x24x1xf32> to vector<24x1xf32>
    %c0_12 = arith.constant 0 : index
    %c0_13 = arith.constant 0 : index
    %c0_14 = arith.constant 0 : index
    %14 = vector.load %arg2[%c0_12, %c0_13, %c0_14] : memref<1x3x8xf32, #tpu.memory_space<vmem>>, vector<1x1x8xf32>
    %15 = vector.shape_cast %14 : vector<1x1x8xf32> to vector<1x8xf32>
    %16 = vector.broadcast %13 : vector<24x1xf32> to vector<24x8xf32>
    %17 = vector.broadcast %15 : vector<1x8xf32> to vector<24x8xf32>
    %18 = arith.subf %16, %17 : vector<24x8xf32>
    %19 = arith.mulf %18, %18 : vector<24x8xf32>
    %c0_15 = arith.constant 0 : index
    %c0_16 = arith.constant 0 : index
    %c1 = arith.constant 1 : index
    %20 = vector.load %arg4[%c0_15, %c0_16, %c1] : memref<1x24x3xf32, #tpu.memory_space<vmem>>, vector<1x24x1xf32>
    %21 = vector.shape_cast %20 : vector<1x24x1xf32> to vector<24x1xf32>
    %c0_17 = arith.constant 0 : index
    %c1_18 = arith.constant 1 : index
    %c0_19 = arith.constant 0 : index
    %22 = vector.load %arg2[%c0_17, %c1_18, %c0_19] : memref<1x3x8xf32, #tpu.memory_space<vmem>>, vector<1x1x8xf32>
    %23 = vector.shape_cast %22 : vector<1x1x8xf32> to vector<1x8xf32>
    %24 = vector.broadcast %21 : vector<24x1xf32> to vector<24x8xf32>
    %25 = vector.broadcast %23 : vector<1x8xf32> to vector<24x8xf32>
    %26 = arith.subf %24, %25 : vector<24x8xf32>
    %27 = arith.mulf %26, %26 : vector<24x8xf32>
    %28 = arith.addf %19, %27 : vector<24x8xf32>
    %c0_20 = arith.constant 0 : index
    %c0_21 = arith.constant 0 : index
    %c2 = arith.constant 2 : index
    %29 = vector.load %arg4[%c0_20, %c0_21, %c2] : memref<1x24x3xf32, #tpu.memory_space<vmem>>, vector<1x24x1xf32>
    %30 = vector.shape_cast %29 : vector<1x24x1xf32> to vector<24x1xf32>
    %c0_22 = arith.constant 0 : index
    %c2_23 = arith.constant 2 : index
    %c0_24 = arith.constant 0 : index
    %31 = vector.load %arg2[%c0_22, %c2_23, %c0_24] : memref<1x3x8xf32, #tpu.memory_space<vmem>>, vector<1x1x8xf32>
    %32 = vector.shape_cast %31 : vector<1x1x8xf32> to vector<1x8xf32>
    %33 = vector.broadcast %30 : vector<24x1xf32> to vector<24x8xf32>
    %34 = vector.broadcast %32 : vector<1x8xf32> to vector<24x8xf32>
    %35 = arith.subf %33, %34 : vector<24x8xf32>
    %36 = arith.mulf %35, %35 : vector<24x8xf32>
    %37 = arith.addf %28, %36 : vector<24x8xf32>
    %38 = tpu.iota {dimensions = array<i32: 1>} : vector<24x8xi32>
    %39 = tpu.bitcast %37 : vector<24x8xf32> -> vector<24x8xi32>
    %c-8_i32 = arith.constant -8 : i32
    %40 = vector.broadcast %c-8_i32 : i32 to vector<24x8xi32>
    %41 = arith.andi %39, %40 : vector<24x8xi32>
    %42 = arith.ori %41, %38 : vector<24x8xi32>
    %cst_25 = arith.constant dense<2147483647> : vector<24xi32>
    %43 = vector.multi_reduction <minsi>, %42, %cst_25 [1] : vector<24x8xi32> to vector<24xi32>
    %44 = vector.shape_cast %43 : vector<24xi32> to vector<24x1xi32>
    %45 = vector.broadcast %44 : vector<24x1xi32> to vector<24x8xi32>
    %46 = arith.cmpi eq, %42, %45 : vector<24x8xi32>
    %cst_26 = arith.constant 0.000000e+00 : f32
    %47 = vector.broadcast %cst_26 : f32 to vector<24x8xf32>
    %48 = arith.select %46, %37, %47 : vector<24x8xi1>, vector<24x8xf32>
    %cst_27 = arith.constant dense<0.000000e+00> : vector<24xf32>
    %49 = vector.multi_reduction <add>, %48, %cst_27 [1] : vector<24x8xf32> to vector<24xf32>
    %50 = vector.shape_cast %49 : vector<24xf32> to vector<24x1xf32>
    %cst_28 = arith.constant 9.99999993E-9 : f32
    %51 = vector.broadcast %cst_28 : f32 to vector<24x1xf32>
    %52 = arith.addf %50, %51 : vector<24x1xf32>
    %cst_29 = arith.constant 1.000000e+00 : f32
    %53 = vector.broadcast %cst_29 : f32 to vector<24x1xf32>
    %54 = arith.divf %53, %52 : vector<24x1xf32>
    %cst_30 = arith.constant 0.000000e+00 : f32
    %55 = vector.shape_cast %54 : vector<24x1xf32> to vector<24x1xf32>
    %56 = vector.broadcast %55 : vector<24x1xf32> to vector<24x8xf32>
    %57 = vector.broadcast %cst_30 : f32 to vector<24x8xf32>
    %58 = arith.select %46, %56, %57 : vector<24x8xi1>, vector<24x8xf32>
    %c2147483647_i32 = arith.constant 2147483647 : i32
    %59 = vector.broadcast %c2147483647_i32 : i32 to vector<24x8xi32>
    %60 = arith.select %46, %59, %42 : vector<24x8xi1>, vector<24x8xi32>
    %cst_31 = arith.constant dense<2147483647> : vector<24xi32>
    %61 = vector.multi_reduction <minsi>, %60, %cst_31 [1] : vector<24x8xi32> to vector<24xi32>
    %62 = vector.shape_cast %61 : vector<24xi32> to vector<24x1xi32>
    %63 = vector.broadcast %62 : vector<24x1xi32> to vector<24x8xi32>
    %64 = arith.cmpi eq, %60, %63 : vector<24x8xi32>
    %cst_32 = arith.constant 0.000000e+00 : f32
    %65 = vector.broadcast %cst_32 : f32 to vector<24x8xf32>
    %66 = arith.select %64, %37, %65 : vector<24x8xi1>, vector<24x8xf32>
    %cst_33 = arith.constant dense<0.000000e+00> : vector<24xf32>
    %67 = vector.multi_reduction <add>, %66, %cst_33 [1] : vector<24x8xf32> to vector<24xf32>
    %68 = vector.shape_cast %67 : vector<24xf32> to vector<24x1xf32>
    %cst_34 = arith.constant 9.99999993E-9 : f32
    %69 = vector.broadcast %cst_34 : f32 to vector<24x1xf32>
    %70 = arith.addf %68, %69 : vector<24x1xf32>
    %cst_35 = arith.constant 1.000000e+00 : f32
    %71 = vector.broadcast %cst_35 : f32 to vector<24x1xf32>
    %72 = arith.divf %71, %70 : vector<24x1xf32>
    %73 = vector.shape_cast %72 : vector<24x1xf32> to vector<24x1xf32>
    %74 = vector.broadcast %73 : vector<24x1xf32> to vector<24x8xf32>
    %75 = arith.select %64, %74, %58 : vector<24x8xi1>, vector<24x8xf32>
    %c2147483647_i32_36 = arith.constant 2147483647 : i32
    %76 = vector.broadcast %c2147483647_i32_36 : i32 to vector<24x8xi32>
    %77 = arith.select %64, %76, %60 : vector<24x8xi1>, vector<24x8xi32>
    %cst_37 = arith.constant dense<2147483647> : vector<24xi32>
    %78 = vector.multi_reduction <minsi>, %77, %cst_37 [1] : vector<24x8xi32> to vector<24xi32>
    %79 = vector.shape_cast %78 : vector<24xi32> to vector<24x1xi32>
    %80 = vector.broadcast %79 : vector<24x1xi32> to vector<24x8xi32>
    %81 = arith.cmpi eq, %77, %80 : vector<24x8xi32>
    %cst_38 = arith.constant 0.000000e+00 : f32
    %82 = vector.broadcast %cst_38 : f32 to vector<24x8xf32>
    %83 = arith.select %81, %37, %82 : vector<24x8xi1>, vector<24x8xf32>
    %cst_39 = arith.constant dense<0.000000e+00> : vector<24xf32>
    %84 = vector.multi_reduction <add>, %83, %cst_39 [1] : vector<24x8xf32> to vector<24xf32>
    %85 = vector.shape_cast %84 : vector<24xf32> to vector<24x1xf32>
    %cst_40 = arith.constant 9.99999993E-9 : f32
    %86 = vector.broadcast %cst_40 : f32 to vector<24x1xf32>
    %87 = arith.addf %85, %86 : vector<24x1xf32>
    %cst_41 = arith.constant 1.000000e+00 : f32
    %88 = vector.broadcast %cst_41 : f32 to vector<24x1xf32>
    %89 = arith.divf %88, %87 : vector<24x1xf32>
    %90 = vector.shape_cast %89 : vector<24x1xf32> to vector<24x1xf32>
    %91 = vector.broadcast %90 : vector<24x1xf32> to vector<24x8xf32>
    %92 = arith.select %81, %91, %75 : vector<24x8xi1>, vector<24x8xf32>
    %cst_42 = arith.constant dense<0.000000e+00> : vector<24xf32>
    %93 = vector.multi_reduction <add>, %92, %cst_42 [1] : vector<24x8xf32> to vector<24xf32>
    %94 = vector.shape_cast %93 : vector<24xf32> to vector<24x1xf32>
    %c0_43 = arith.constant 0 : index
    %c0_44 = arith.constant 0 : index
    %c0_45 = arith.constant 0 : index
    %95 = vector.load %arg3[%c0_43, %c0_44, %c0_45] : memref<1x8x32xf32, #tpu.memory_space<vmem>>, vector<1x8x32xf32>
    %96 = vector.shape_cast %95 : vector<1x8x32xf32> to vector<8x32xf32>
    %cst_46 = arith.constant dense<0.000000e+00> : vector<24x32xf32>
    %97 = tpu.matmul %92, %96, %cst_46 {dimension_numbers = #tpu.dot_dimension_numbers<[1], [0], [0], [1], [0, 0, 1, 1], [], []>} : vector<24x8xf32>, vector<8x32xf32>, vector<24x32xf32> -> vector<24x32xf32>
    %cst_47 = arith.constant 1.000000e+00 : f32
    %98 = vector.broadcast %cst_47 : f32 to vector<24x1xf32>
    %99 = arith.divf %98, %94 : vector<24x1xf32>
    %100 = vector.broadcast %99 : vector<24x1xf32> to vector<24x32xf32>
    %101 = arith.mulf %97, %100 : vector<24x32xf32>
    %102 = arith.addf %101, %11 : vector<24x32xf32>
    %c0_48 = arith.constant 0 : index
    %c0_49 = arith.constant 0 : index
    %c0_50 = arith.constant 0 : index
    %103 = vector.load %arg9[%c0_48, %c0_49, %c0_50] : memref<1x24x32xf32, #tpu.memory_space<vmem>>, vector<1x24x32xf32>
    %104 = vector.shape_cast %103 : vector<1x24x32xf32> to vector<24x32xf32>
    %105 = vector.shape_cast %102 : vector<24x32xf32> to vector<1x24x32xf32>
    tpu.vector_store %arg9[%c0_48, %c0_49, %c0_50], %105 {strides = array<i32>} : memref<1x24x32xf32, #tpu.memory_space<vmem>>, vector<1x24x32xf32>,
    return
  }
  func.func @transform_0(%arg0: i32, %arg1: i32) -> (i32, i32, i32) {
    %c0_i32 = arith.constant 0 : i32
    %c0_i32_0 = arith.constant 0 : i32
    %c0_i32_1 = arith.constant 0 : i32
    return %arg0, %c0_i32, %c0_i32_0 : i32, i32, i32
  }
  func.func @transform_1(%arg0: i32, %arg1: i32) -> (i32, i32, i32) {
    %c0_i32 = arith.constant 0 : i32
    %c0_i32_0 = arith.constant 0 : i32
    %c0_i32_1 = arith.constant 0 : i32
    return %arg0, %c0_i32, %c0_i32_0 : i32, i32, i32
  }
  func.func @transform_2(%arg0: i32, %arg1: i32) -> (i32, i32, i32) {
    %c0_i32 = arith.constant 0 : i32
    %c0_i32_0 = arith.constant 0 : i32
    return %arg0, %arg1, %c0_i32 : i32, i32, i32
  }
  func.func @transform_3(%arg0: i32, %arg1: i32) -> (i32, i32, i32) {
    %c0_i32 = arith.constant 0 : i32
    %c0_i32_0 = arith.constant 0 : i32
    return %arg0, %arg1, %c0_i32 : i32, i32, i32
  }
  func.func @transform_4(%arg0: i32, %arg1: i32) -> (i32, i32) {
    %c0_i32 = arith.constant 0 : i32
    %c0_i32_0 = arith.constant 0 : i32
    %c0_i32_1 = arith.constant 0 : i32
    return %c0_i32, %c0_i32_0 : i32, i32
  }
  func.func @transform_5(%arg0: i32, %arg1: i32) -> (i32, i32) {
    %c0_i32 = arith.constant 0 : i32
    %c0_i32_0 = arith.constant 0 : i32
    %c0_i32_1 = arith.constant 0 : i32
    return %c0_i32, %c0_i32_0 : i32, i32
  }
  func.func @transform_6(%arg0: i32, %arg1: i32) -> (i32, i32) {
    %c0_i32 = arith.constant 0 : i32
    %c0_i32_0 = arith.constant 0 : i32
    %c0_i32_1 = arith.constant 0 : i32
    return %c0_i32, %c0_i32_0 : i32, i32
  }
  func.func @transform_7(%arg0: i32, %arg1: i32) -> (i32, i32, i32) {
    %c0_i32 = arith.constant 0 : i32
    %c0_i32_0 = arith.constant 0 : i32
    return %arg0, %arg1, %c0_i32 : i32, i32, i32
  }
}

</mosaic_0001>

<bundles_post_ra>
// kernel: transition_up.4
= control target key start
LH: loop header
LB: loop body
LE: loop exit
PB: predicated region body
PF: predicated region fallthrough
CT: control target
= control target key end

     0   :  { %s505_s12 = smov 0   ;;  %s507_s13 = smov 0   ;;  %s573_s0 = inlined_call_operand.vmem [shape: f32[32,32], index: 0, kind: input, shape index: {}]   ;;  %s574_s1 = inlined_call_operand.vmem [shape: f32[32,32], index: 1, kind: input, shape index: {}]   ;;  %s575_s2 = inlined_call_operand.vmem [shape: f32[2,1,32], index: 2, kind: output, shape index: {0}]   ;;  %s576_s3 = inlined_call_operand.vmem [shape: f32[2,1,32], index: 3, kind: output, shape index: {1}]  }
   0x1   :  { %s509_s14 = smov 0  }
   0x2 LB: > { %s26_s15 = sadd.s32 1, %s478_s13  ;;  %p403_p0 = scmp.ge.s32.totalorder %s482_s14, 1  ;;  %s482_s14 = sphi %s509_s14, %s14_s14   ;;  %s478_s13 = sphi %s507_s13, %s578_s13   ;;  %s474_s12 = sphi %s505_s12, %s577_s12  }
   0x3   : > { %p28_p1 = scmp.ge.s32.totalorder %s26_s15, 2  ;;  %p157_p2 = scmp.lt.s32.totalorder %s482_s14, 3 }
   0x5   : > { %s580_s15 = smov (%p28_p1, %s26_s15), 0  ;;  %p158_p3 = pnand %p403_p0, %p157_p2 }
   0x6   : > { %v206_v0 = vld [vmem:[%s574_s1] sm:$0xff] (!%p158_p3)  ;;  %v207_v1 = vld [vmem:[%s574_s1 + $0x8] sm:$0xff] (!%p158_p3)  ;;  %v208_v2 = vld [vmem:[%s574_s1 + $0x10] sm:$0xff] (!%p158_p3)  ;;  %s404_s22 = sshll.u32 (!%p158_p3), %s474_s12, 1  ;;  %vm210_vm0 = vcmask (!%p158_p3), 261120   ;;  %p191_p5 = scmp.lt.s32.totalorder (!%p158_p3), %s474_s12, 1 }
   0x7   : > { %161 = sbr.rel (%p158_p3) target bundleno = 252 (0xfc), region = 28  ;;  %v427_v3 = vpack.c.bf16 (!%p158_p3), %v207_v1, %v206_v0  ;;  %v209_v4 = vld [vmem:[%s574_s1 + $0x18] sm:$0xff] (!%p158_p3)  ;;  %p185_p4 = scmp.lt.s32.totalorder (!%p158_p3), %s404_s22, 3  ;;  %vm201_vm1 = vcmask (!%p158_p3), 253952   ;;  %v484_v8 = vmov (!%p158_p3), 0.0  }
   0x8   : > { %v431_v5 = vpack.c.bf16 (!%p158_p3), %v209_v4, %v208_v2 }
   0x9   : > { %428 = vmatprep.subr.bf16.mxu0 (!%p158_p3), %v427_v3 }
   0xa   : > { %430 = vmatpush3.bf16.msra.mxu0 (!%p158_p3), %v427_v3 }
   0xb   : > { %432 = vmatprep.subr.bf16.mxu0 (!%p158_p3), %v431_v5 }
   0xe   : > { %s582_s22 = smov (!%p185_p4, %s404_s22), 3  ;;  %434 = vmatpush3.bf16.msra.mxu0 %v431_v5  ;;  %s584_s12 = smov (!%p191_p5, %s474_s12), 1 }
   0xf   : > { %s405_s25 = sshll.u32 %s582_s22, 3  ;;  %s193_s4 = scalar_lea.vmem %s575_s2, %s584_s12 }
  0x10   : > { %s188_s28 = scalar_lea.vmem %s573_s0, %s405_s25  ;;  %s551_s7 = scalar_lea.vmem %s576_s3, %s584_s12  ;;  %202 = vst.msk [vmem:[%s193_s4] sm:$0x1] %vm201_vm1, %v484_v8 }
  0x11   : > { %v204_v6 = vld [vmem:[%s188_s28] sm:$0xff]  ;;  %v205_v7 = vld [vmem:[%s188_s28 + $0x8] sm:$0xff]  ;;  %203 = vst.msk [vmem:[%s551_s7] sm:$0x1] %vm201_vm1, %v484_v8 }
  0x12   : > { %424 = vmatprep.mubr.msk.f32.mxu0 %vm210_vm0, %v204_v6 }
  0x13   : > { %425 = vmatmul.mubr.msk.f32.vlgmr.msra.gmra.mrb[0].mxu0 %vm210_vm0, %v205_v7 }
  0x17   : > { %v292_v28 = vld [vmem:[%s193_s4] sm:$0x1] }
  0x18   : > { %v305_v31 = vld [vmem:[%s551_s7] sm:$0x1] }
  0xe6   : > { %v426_v9 = vpop.f32.mrb[0].mxu0 }
  0xe7   : > { %v294_v10 = vsel %vm210_vm0, %v426_v9, 0.0  ;;  %v307_v11 = vmul.f32 %v426_v9, %v426_v9  ;;  %v283_v12 = vpop.f32.mrb[1].mxu0 }
  0xe8   : > { %v293_v13 = vsel %vm210_vm0, %v283_v12, 0.0  ;;  %v306_v14 = vmul.f32 %v283_v12, %v283_v12 }
  0xe9   : > { %v309_v15 = vsel %vm210_vm0, %v307_v11, 0.0  ;;  %v295_v16 = vadd.f32 %v294_v10, %v293_v13 }
  0xea   : > { %v308_v17 = vsel %vm210_vm0, %v306_v14, 0.0 }
  0xeb   : > { %v296_v18 = vrot.slane %v295_v16, 4  ;;  %v310_v19 = vadd.f32 %v309_v15, %v308_v17 }
  0xed   : > { %v297_v20 = vadd.f32 %v296_v18, %v295_v16  ;;  %v311_v21 = vrot.slane %v310_v19, 4 }
  0xef   : > { %v298_v22 = vrot.slane %v297_v20, 2  ;;  %v312_v23 = vadd.f32 %v311_v21, %v310_v19 }
  0xf1   : > { %v299_v24 = vadd.f32 %v298_v22, %v297_v20  ;;  %v313_v25 = vrot.slane %v312_v23, 2 }
  0xf3   : > { %v300_v26 = vrot.slane %v299_v24, 1  ;;  %v314_v27 = vadd.f32 %v313_v25, %v312_v23 }
  0xf5   : > { %v301_v29 = vadd.f32 %v300_v26, %v299_v24  ;;  %v315_v30 = vrot.slane %v314_v27, 1 }
  0xf7   : > { %v302_v32 = vadd.f32 %v301_v29, %v292_v28  ;;  %v316_v33 = vadd.f32 %v315_v30, %v314_v27 }
  0xf9   : > { %304 = vst.msk [vmem:[%s193_s4] sm:$0x1] %vm201_vm1, %v302_v32  ;;  %v317_v34 = vadd.f32 %v316_v33, %v305_v31 }
  0xfb   : > { %318 = vst.msk [vmem:[%s551_s7] sm:$0x1] %vm201_vm1, %v317_v34 }
  0xfc PF: > { %s14_s14 = sadd.s32 1, %s482_s14   ;;  %s577_s12 = smov %s478_s13 }
  0xfd   : > { %p11_p6 = scmp.ge.s32.totalorder %s14_s14, 4   ;;  %s578_s13 = smov %s580_s15 }
  0xff   :  { %13 = sbr.rel (!%p11_p6) target bundleno = 2 (0x2), region = 74 }

// kernel: transition_up.5
= control target key start
LH: loop header
LB: loop body
LE: loop exit
PB: predicated region body
PF: predicated region fallthrough
CT: control target
= control target key end

     0   :  { %s558_s12 = smov 0   ;;  %s560_s13 = smov 0   ;;  %s634_s0 = inlined_call_operand.vmem [shape: f32[80,16], index: 0, kind: input, shape index: {}]   ;;  %s635_s1 = inlined_call_operand.vmem [shape: f32[16,32], index: 1, kind: input, shape index: {}]   ;;  %s636_s2 = inlined_call_operand.vmem [shape: f32[2,1,32], index: 2, kind: output, shape index: {0}]   ;;  %s637_s3 = inlined_call_operand.vmem [shape: f32[2,1,32], index: 3, kind: output, shape index: {1}]  }
   0x1   :  { %s562_s14 = smov 0  }
   0x2 LB: > { %s26_s15 = sadd.s32 1, %s529_s13  ;;  %p444_p0 = scmp.ge.s32.totalorder %s533_s14, 1  ;;  %s533_s14 = sphi %s562_s14, %s14_s14   ;;  %s529_s13 = sphi %s560_s13, %s639_s13   ;;  %s525_s12 = sphi %s558_s12, %s638_s12  }
   0x3   : > { %p28_p1 = scmp.ge.s32.totalorder %s26_s15, 2  ;;  %p157_p2 = scmp.lt.s32.totalorder %s533_s14, 3 }
   0x5   : > { %s641_s15 = smov (%p28_p1, %s26_s15), 0  ;;  %p158_p3 = pnand %p444_p0, %p157_p2 }
   0x6   : > { %v209_v0 = vld [vmem:[%s635_s1] sm:$0xff] (!%p158_p3)  ;;  %v210_v1 = vld [vmem:[%s635_s1 + $0x8] sm:$0xff] (!%p158_p3)  ;;  %s184_s20 = smul.u32 (!%p158_p3), 5, %s525_s12  ;;  %v535_v2 = vmov (!%p158_p3), 0.0|0.0   ;;  %vm536_vm0 = vmmov (!%p158_p3), 0   ;;  %v537_v4 = vmov (!%p158_p3), 0.0  }
   0x7   : > { %161 = sbr.rel (%p158_p3) target bundleno = 262 (0x106), region = 28  ;;  %479 = vmatprep.subr.bf16.mxu0 (!%p158_p3), %v535_v2  ;;  %v480_v3 = vpack.c.bf16 (!%p158_p3), %v210_v1, %v209_v0  ;;  %464 = vmatprep.mubr.msk.f32.mxu0 (!%p158_p3), %vm536_vm0, %v537_v4  ;;  %vm211_vm1 = vcmask (!%p158_p3), 130048   ;;  %p191_p5 = scmp.lt.s32.totalorder (!%p158_p3), %s525_s12, 1  ;;  %vm201_vm2 = vcmask (!%p158_p3), 253952   ;;  %vm318_vm3 = vcmask (!%p158_p3), 261120  }
   0x8   : > { %p185_p4 = scmp.lt.s32.totalorder (!%p158_p3), %s184_s20, 9  ;;  %482 = vmatprep.subr.bf16.mxu1 (!%p158_p3), %v535_v2  ;;  %473 = vmatprep.mubr.msk.f32.mxu1 (!%p158_p3), %vm536_vm0, %v537_v4 }
   0x9   : > { %481 = vmatpush3.bf16.msra.mxu0 (!%p158_p3), %v480_v3  ;;  %483 = vmatpush3.bf16.msra.mxu1 (!%p158_p3), %v480_v3 }
   0xe   : > { %s643_s20 = smov (!%p185_p4, %s184_s20), 9  ;;  %s645_s12 = smov (!%p191_p5, %s525_s12), 1 }
   0xf   : > { %s445_s21 = sshll.u32 %s643_s20, 3  ;;  %s598_s27 = scalar_lea.vmem %s636_s2, %s645_s12 }
  0x10   : > { %s188_s24 = scalar_lea.vmem %s634_s0, %s445_s21  ;;  %s603_s30 = scalar_lea.vmem %s637_s3, %s645_s12  ;;  %202 = vst.msk [vmem:[%s598_s27] sm:$0x1] %vm201_vm2, %v537_v4 }
  0x11   : > { %v204_v5 = vld [vmem:[%s188_s24] sm:$0xff]  ;;  %v207_v6 = vld [vmem:[%s188_s24 + $0x18] sm:$0xff]  ;;  %v205_v7 = vld [vmem:[%s188_s24 + $0x8] sm:$0xff]  ;;  %203 = vst.msk [vmem:[%s603_s30] sm:$0x1] %vm201_vm2, %v537_v4 }
  0x12   : > { %465 = vmatmul.mubr.msk.f32.vlgmr.msra.gmra.mrb[0].mxu0 %vm211_vm1, %v204_v5  ;;  %474 = vmatmul.mubr.msk.f32.vlgmr.msra.gmra.mrb[0].mxu1 %vm211_vm1, %v207_v6  ;;  %v208_v8 = vld [vmem:[%s188_s24 + $0x20] sm:$0xff]  ;;  %v206_v9 = vld [vmem:[%s188_s24 + $0x10] sm:$0xff] }
  0x13   : > { %467 = vmatprep.mubr.msk.f32.mxu0 %vm536_vm0, %v537_v4  ;;  %476 = vmatprep.mubr.msk.f32.mxu1 %vm536_vm0, %v537_v4 }
  0x16   : > { %468 = vmatmul.mubr.msk.f32.gmra.mrb[2].mxu0 %vm211_vm1, %v205_v7  ;;  %477 = vmatmul.mubr.msk.f32.gmra.mrb[2].mxu1 %vm211_vm1, %v208_v8 }
  0x17   : > { %470 = vmatprep.mubr.msk.f32.mxu0 %vm536_vm0, %v537_v4  ;;  %v317_v52 = vld [vmem:[%s598_s27] sm:$0x1] }
  0x18   : > { %v337_v55 = vld [vmem:[%s603_s30] sm:$0x1] }
  0x1a   : > { %471 = vmatmul.mubr.msk.f32.gmra.mrb[4].mxu0 %vm211_vm1, %v206_v9 }
  0xe5   : > { %v293_v10 = vpop.f32.mrb[0].mxu0  ;;  %v308_v11 = vpop.f32.mrb[0].mxu1 }
  0xe6   : > { %v466_v12 = vpop.f32.mrb[1].mxu0  ;;  %v475_v13 = vpop.f32.mrb[1].mxu1  ;;  %v338_v14 = vmul.f32 %v293_v10, %v293_v10  ;;  %v319_v17 = vsel %vm318_vm3, %v293_v10, 0.0  ;;  %v341_v27 = vmul.f32 %v308_v11, %v308_v11  ;;  %v324_v33 = vsel %vm318_vm3, %v308_v11, 0.0 }
  0xe8   : > { %v343_v23 = vsel %vm318_vm3, %v338_v14, 0.0  ;;  %v348_v38 = vsel %vm318_vm3, %v341_v27, 0.0 }
  0xe9   : > { %v298_v15 = vpop.f32.mrb[2].mxu0  ;;  %v313_v16 = vpop.f32.mrb[2].mxu1 }
  0xea   : > { %v320_v18 = vsel %vm318_vm3, %v298_v15, 0.0  ;;  %v339_v19 = vmul.f32 %v298_v15, %v298_v15  ;;  %v469_v20 = vpop.f32.mrb[3].mxu0  ;;  %v478_v21 = vpop.f32.mrb[3].mxu1  ;;  %v342_v31 = vmul.f32 %v313_v16, %v313_v16  ;;  %v326_v35 = vsel %vm318_vm3, %v313_v16, 0.0 }
  0xeb   : > { %v321_v22 = vadd.f32 %v320_v18, %v319_v17 }
  0xec   : > { %v344_v24 = vsel %vm318_vm3, %v339_v19, 0.0  ;;  %v350_v39 = vsel %vm318_vm3, %v342_v31, 0.0 }
  0xed   : > { %v345_v25 = vadd.f32 %v344_v24, %v343_v23  ;;  %v303_v26 = vpop.f32.mrb[4].mxu0 }
  0xee   : > { %v322_v28 = vsel %vm318_vm3, %v303_v26, 0.0  ;;  %v340_v29 = vmul.f32 %v303_v26, %v303_v26  ;;  %v472_v30 = vpop.f32.mrb[5].mxu0 }
  0xef   : > { %v323_v32 = vadd.f32 %v322_v28, %v321_v22 }
  0xf0   : > { %v346_v34 = vsel %vm318_vm3, %v340_v29, 0.0 }
  0xf1   : > { %v347_v36 = vadd.f32 %v346_v34, %v345_v25  ;;  %v325_v37 = vadd.f32 %v324_v33, %v323_v32 }
  0xf3   : > { %v327_v40 = vadd.f32 %v326_v35, %v325_v37  ;;  %v349_v41 = vadd.f32 %v348_v38, %v347_v36 }
  0xf5   : > { %v328_v42 = vrot.slane %v327_v40, 4  ;;  %v351_v43 = vadd.f32 %v350_v39, %v349_v41 }
  0xf7   : > { %v329_v44 = vadd.f32 %v328_v42, %v327_v40  ;;  %v352_v45 = vrot.slane %v351_v43, 4 }
  0xf9   : > { %v330_v46 = vrot.slane %v329_v44, 2  ;;  %v353_v47 = vadd.f32 %v352_v45, %v351_v43 }
  0xfb   : > { %v331_v48 = vadd.f32 %v330_v46, %v329_v44  ;;  %v354_v49 = vrot.slane %v353_v47, 2 }
  0xfd   : > { %v332_v50 = vrot.slane %v331_v48, 1  ;;  %v355_v51 = vadd.f32 %v354_v49, %v353_v47 }
  0xff   : > { %v333_v53 = vadd.f32 %v332_v50, %v331_v48  ;;  %v356_v54 = vrot.slane %v355_v51, 1 }
 0x101   : > { %v334_v56 = vadd.f32 %v333_v53, %v317_v52  ;;  %v357_v57 = vadd.f32 %v356_v54, %v355_v51 }
 0x103   : > { %336 = vst.msk [vmem:[%s598_s27] sm:$0x1] %vm201_vm2, %v334_v56  ;;  %v358_v58 = vadd.f32 %v357_v57, %v337_v55 }
 0x105   : > { %359 = vst.msk [vmem:[%s603_s30] sm:$0x1] %vm201_vm2, %v358_v58 }
 0x106 PF: > { %s14_s14 = sadd.s32 1, %s533_s14   ;;  %s638_s12 = smov %s529_s13 }
 0x107   : > { %p11_p6 = scmp.ge.s32.totalorder %s14_s14, 4   ;;  %s639_s13 = smov %s641_s15 }
 0x109   :  { %13 = sbr.rel (!%p11_p6) target bundleno = 2 (0x2), region = 74 }

// kernel: transition_up.6
= control target key start
LH: loop header
LB: loop body
LE: loop exit
PB: predicated region body
PF: predicated region fallthrough
CT: control target
= control target key end

     0   :  { %vm23_vm0 = vcmask 261120   ;;  %s219_s1 = inlined_call_operand.vmem [shape: f32[32,32], index: 1, kind: input, shape index: {}]   ;;  %s220_s0 = inlined_call_operand.vmem [shape: f32[16,32], index: 0, kind: input, shape index: {}]   ;;  %s221_s2 = inlined_call_operand.vmem [shape: f32[1,32], index: 2, kind: input, shape index: {}]   ;;  %s222_s3 = inlined_call_operand.vmem [shape: f32[1,32], index: 3, kind: input, shape index: {}]   ;;  %s223_s4 = inlined_call_operand.vmem [shape: f32[16,32], index: 4, kind: output, shape index: {}]  }
   0x1   :  { %v19_v0 = vld [vmem:[%s219_s1] sm:$0xff]  ;;  %v20_v1 = vld [vmem:[%s219_s1 + $0x8] sm:$0xff]  ;;  %v21_v2 = vld [vmem:[%s219_s1 + $0x10] sm:$0xff] }
   0x2   :  { %v152_v3 = vpack.c.bf16 %v20_v1, %v19_v0  ;;  %v22_v4 = vld [vmem:[%s219_s1 + $0x18] sm:$0xff]  ;;  %v17_v5 = vld [vmem:[%s220_s0] sm:$0xff]  ;;  %v18_v7 = vld [vmem:[%s220_s0 + $0x8] sm:$0xff] }
   0x3   :  { %v156_v6 = vpack.c.bf16 %v22_v4, %v21_v2  ;;  %149 = vmatprep.mubr.msk.f32.mxu0 %vm23_vm0, %v17_v5  ;;  %v133_v8 = vld [vmem:[%s221_s2] ss:$0 sm:$0xff] }
   0x4   :  { %153 = vmatprep.subr.bf16.mxu0 %v152_v3  ;;  %v134_v10 = vld [vmem:[%s222_s3] ss:$0 sm:$0xff] }
   0x5   :  { %155 = vmatpush3.bf16.msra.mxu0 %v152_v3 }
   0x6   :  { %157 = vmatprep.subr.bf16.mxu0 %v156_v6 }
   0x9   :  { %159 = vmatpush3.bf16.msra.mxu0 %v156_v6 }
   0xc   :  { %150 = vmatmul.mubr.msk.f32.vlgmr.msra.gmra.mrb[0].mxu0 %vm23_vm0, %v18_v7 }
  0xdf   :  { %v151_v9 = vpop.f32.mrb[0].mxu0 }
  0xe0   :  { %v113_v11 = vmul.f32 %v151_v9, %v133_v8  ;;  %v96_v12 = vpop.f32.mrb[1].mxu0 }
  0xe1   :  { %v112_v13 = vmul.f32 %v133_v8, %v96_v12 }
  0xe2   :  { %v122_v14 = vadd.f32 %v134_v10, %v113_v11 }
  0xe3   :  { %v121_v15 = vadd.f32 %v134_v10, %v112_v13 }
  0xe4   :  { %v124_v16 = vmax.f32 %v122_v14, 0.0 }
  0xe5   :  { %v123_v17 = vmax.f32 %v121_v15, 0.0 }
  0xe6   :  { %126 = vst.msk [vmem:[%s223_s4 + $0x8] sm:$0xff] %vm23_vm0, %v124_v16 }
  0xe7   :  { %125 = vst.msk [vmem:[%s223_s4] sm:$0xff] %vm23_vm0, %v123_v17 }

// kernel: transition_up.7
= control target key start
LH: loop header
LB: loop body
LE: loop exit
PB: predicated region body
PF: predicated region fallthrough
CT: control target
= control target key end

     0   :  { %s1263_s24 = smov 0   ;;  %s1265_s25 = smov 0   ;;  %s1526_s0 = inlined_call_operand.vmem [shape: f32[2,3,8], index: 0, kind: input, shape index: {}]   ;;  %s1527_s1 = inlined_call_operand.vmem [shape: f32[2,8,32], index: 1, kind: input, shape index: {}]   ;;  %s1528_s2 = inlined_call_operand.vmem [shape: f32[2,24,3], index: 2, kind: input, shape index: {}]   ;;  %s1529_s3 = inlined_call_operand.vmem [shape: f32[2,24,16], index: 3, kind: input, shape index: {}]   ;;  %s1530_s4 = inlined_call_operand.vmem [shape: f32[16,32], index: 4, kind: input, shape index: {}]   ;;  %s1531_s5 = inlined_call_operand.vmem [shape: f32[1,32], index: 5, kind: input, shape index: {}]   ;;  %s1532_s6 = inlined_call_operand.vmem [shape: f32[1,32], index: 6, kind: input, shape index: {}]   ;;  %s1533_s7 = inlined_call_operand.vmem [shape: f32[2,24,32], index: 7, kind: output, shape index: {}]  }
   0x1   :  { %s1267_s26 = smov 0  }
   0x2 LB: > { %s29_s27 = sadd.s32 1, %s1211_s25  ;;  %p1075_p0 = scmp.ge.s32.totalorder %s1215_s26, 1  ;;  %s1215_s26 = sphi %s1267_s26, %s17_s26   ;;  %s1211_s25 = sphi %s1265_s25, %s1535_s25   ;;  %s1207_s24 = sphi %s1263_s24, %s1534_s24  }
   0x3   : > { %p31_p1 = scmp.ge.s32.totalorder %s29_s27, 2  ;;  %p293_p2 = scmp.lt.s32.totalorder %s1215_s26, 3 }
   0x5   : > { %s1537_s27 = smov (%p31_p1, %s29_s27), 0  ;;  %p294_p3 = pnand %p1075_p0, %p293_p2 }
   0x6   : > { %p350_p4 = scmp.lt.s32.totalorder (!%p294_p3), %s1207_s24, 1  ;;  %v1217_v0 = vmov (!%p294_p3), 2   ;;  %v1218_v1 = vmov (!%p294_p3), 0   ;;  %v1219_v4 = vmov (!%p294_p3), 1   ;;  %v587_v18 = vlaneseq (!%p294_p3) }
   0x7   : > { %297 = sbr.rel (%p294_p3) target bundleno = 1444 (0x5a4), region = 48  ;;  %1163 = vset.pattern.permute.xlu1 (!%p294_p3), %v1217_v0  ;;  %1161 = vset.pattern.permute.xlu0 (!%p294_p3), %v1218_v1  ;;  %vm598_vm0 = vcmask (!%p294_p3), 64512  }
   0x8   : > { %v588_v27 = vand.u32 (!%p294_p3), 127, %v587_v18 }
   0xe   : > { %s1539_s24 = smov (!%p350_p4, %s1207_s24), 1 }
   0xf   : > { %s1284_s28 = smul.u32 24, %s1539_s24  ;;  %s1076_s9 = sshll.u32 %s1539_s24, 2 }
  0x10   : > { %s353_s12 = scalar_lea.vmem %s1526_s0, %s1076_s9  ;;  %s1077_s20 = sshll.u32 %s1539_s24, 3 }
  0x11   : > { %s366_s8 = scalar_lea.vmem %s1528_s2, %s1284_s28  ;;  %v1086_v6 = vld [vmem:[%s353_s12] ss:$0 sm:$0xff]  ;;  %v1088_v10 = vld [vmem:[%s353_s12 + $0x2] ss:$0 sm:$0xff]  ;;  %v1087_v11 = vld [vmem:[%s353_s12 + $0x1] ss:$0 sm:$0xff]  ;;  %s376_s19 = scalar_lea.vmem %s1529_s3, %s1284_s28 }
  0x12   : > { %v506_v2 = vld [vmem:[%s366_s8] sm:$0xff]  ;;  %v507_v3 = vld [vmem:[%s366_s8 + $0x8] sm:$0xff]  ;;  %v508_v5 = vld [vmem:[%s366_s8 + $0x10] sm:$0xff]  ;;  %s357_s23 = scalar_lea.vmem %s1527_s1, %s1077_s20  ;;  %s386_s11 = scalar_lea.vmem %s1533_s7, %s1284_s28 }
  0x13   : > { %563 = vperm.xlu1 %1163, %v506_v2   ;;  %512 = vperm.xlu0 %1161, %v506_v2  }
  0x17   : > { %1164 = vset.pattern.permute.xlu1 %v1218_v1  ;;  %1162 = vset.pattern.permute.xlu0 %v1219_v4 }
  0x18   : > { %517 = vperm.xlu1 %1164, %v507_v3   ;;  %537 = vperm.xlu0 %1162, %v506_v2  }
  0x1c   : > { %1165 = vset.pattern.permute.xlu1 %v1219_v4  ;;  %1166 = vset.pattern.permute.xlu0 %v1217_v0 }
  0x1d   : > { %541 = vperm.xlu1 %1165, %v507_v3   ;;  %567 = vperm.xlu0 %1166, %v507_v3  }
  0x21   : > { %1167 = vset.pattern.permute.xlu1 %v1218_v1  ;;  %571 = vperm.xlu0 %1166, %v508_v5  }
  0x22   : > { %522 = vperm.xlu1 %1167, %v508_v5  }
  0x26   : > { %1168 = vset.pattern.permute.xlu1 %v1219_v4 }
  0x27   : > { %545 = vperm.xlu1 %1168, %v508_v5  }
  0x92   : > { %v564_v7 = vpop.permute.xlu1 %563  ;;  %v513_v8 = vpop.permute.xlu0 %512 }
  0x93   : > { %v529_v9 = vsub.f32 %v513_v8, %v1086_v6  ;;  %v578_v14 = vsub.f32 %v564_v7, %v1088_v10 }
  0x95   : > { %v532_v15 = vmul.f32 %v529_v9, %v529_v9  ;;  %v581_v20 = vmul.f32 %v578_v14, %v578_v14 }
  0x97   : > { %v518_v12 = vpop.permute.xlu1 %517  ;;  %v538_v13 = vpop.permute.xlu0 %537 }
  0x98   : > { %v552_v16 = vsub.f32 %v538_v13, %v1087_v11  ;;  %v530_v19 = vsub.f32 %v518_v12, %v1086_v6 }
  0x9a   : > { %v555_v17 = vmul.f32 %v552_v16, %v552_v16  ;;  %v533_v28 = vmul.f32 %v530_v19, %v530_v19 }
  0x9c   : > { %v558_v21 = vadd.f32 %v555_v17, %v532_v15  ;;  %v542_v22 = vpop.permute.xlu1 %541  ;;  %v568_v23 = vpop.permute.xlu0 %567 }
  0x9d   : > { %v553_v24 = vsub.f32 %v542_v22, %v1087_v11  ;;  %v579_v25 = vsub.f32 %v568_v23, %v1088_v10 }
  0x9e   : > { %v1294_v26 = vadd.f32 %v581_v20, %v558_v21 }
  0x9f   : > { %v556_v29 = vmul.f32 %v553_v24, %v553_v24  ;;  %v582_v30 = vmul.f32 %v579_v25, %v579_v25 }
  0xa0   : > { %v592_v31 = vand.u32 4294967288, %v1294_v26  ;;  %v572_v36 = vpop.permute.xlu0 %571 }
  0xa1   : > { %v559_v32 = vadd.f32 %v556_v29, %v533_v28  ;;  %v523_v33 = vpop.permute.xlu1 %522  ;;  %v580_v42 = vsub.f32 %v572_v36, %v1088_v10 }
  0xa2   : > { %v1297_v34 = vor.u32 %v592_v31, %v588_v27  ;;  %v531_v38 = vsub.f32 %v523_v33, %v1086_v6 }
  0xa3   : > { %v1299_v35 = vadd.f32 %v582_v30, %v559_v32  ;;  %v583_v50 = vmul.f32 %v580_v42, %v580_v42 }
  0xa4   : > { %v599_v37 = vsel %vm598_vm0, %v1297_v34, 2147483647  ;;  %v534_v46 = vmul.f32 %v531_v38, %v531_v38 }
  0xa5   : > { %v601_v39 = vshra.s32 %v599_v37, 16  ;;  %v593_v40 = vand.u32 4294967288, %v1299_v35  ;;  %v600_v59 = vand.u32 65535, %v599_v37 }
  0xa6   : > { %v546_v41 = vpop.permute.xlu1 %545 }
  0xa7   : > { %v554_v43 = vsub.f32 %v546_v41, %v1087_v11  ;;  %v603_v44 = vcvt.s32.f32 %v601_v39  ;;  %v1304_v45 = vor.u32 %v593_v40, %v588_v27  ;;  %v602_v61 = vcvt.s32.f32 %v600_v59 }
  0xa9   : > { %v557_v47 = vmul.f32 %v554_v43, %v554_v43  ;;  %604 = vmin.xlane.f32.xlu1 %v603_v44  ;;  %v614_v48 = vsel %vm598_vm0, %v1304_v45, 2147483647 }
  0xaa   : > { %v616_v49 = vshra.s32 %v614_v48, 16  ;;  %v615_v62 = vand.u32 65535, %v614_v48 }
  0xab   : > { %v560_v51 = vadd.f32 %v557_v47, %v534_v46 }
  0xac   : > { %v618_v52 = vcvt.s32.f32 %v616_v49  ;;  %v617_v1 = vcvt.s32.f32 %v615_v62 }
  0xad   : > { %v1308_v53 = vadd.f32 %v583_v50, %v560_v51 }
  0xae   : > { %619 = vmin.xlane.f32.xlu0 %v618_v52 }
  0xaf   : > { %v594_v54 = vand.u32 4294967288, %v1308_v53 }
  0xb1   : > { %v1311_v55 = vor.u32 %v594_v54, %v588_v27 }
  0xb3   : > { %v629_v56 = vsel %vm598_vm0, %v1311_v55, 2147483647 }
  0xb4   : > { %v631_v57 = vshra.s32 %v629_v56, 16  ;;  %v630_v3 = vand.u32 65535, %v629_v56 }
  0xb6   : > { %v633_v58 = vcvt.s32.f32 %v631_v57  ;;  %v632_v5 = vcvt.s32.f32 %v630_v3 }
  0xb8   : > { %634 = vmin.xlane.f32.xlu0 %v633_v58 }
 0x136   : > { %v605_v60 = vpop.xlane.xlu1 %604 }
 0x137   : > { %vm606_vm1 = vcmp.eq.f32.partialorder %v603_v44, %v605_v60  ;;  %v611_v7 = vcvt.f32.s32 %v605_v60 }
 0x138   : > { %v607_v63 = vsel %vm606_vm1, %v602_v61, inf }
 0x139   : > { %608 = vmin.xlane.f32.xlu1 %v607_v63  ;;  %v612_v9 = vshll.u32 %v611_v7, 16 }
 0x13b   : > { %v620_v0 = vpop.xlane.xlu0 %619 }
 0x13c   : > { %vm621_vm2 = vcmp.eq.f32.partialorder %v618_v52, %v620_v0  ;;  %v626_v11 = vcvt.f32.s32 %v620_v0 }
 0x13d   : > { %v622_v2 = vsel %vm621_vm2, %v617_v1, inf }
 0x13e   : > { %623 = vmin.xlane.f32.xlu0 %v622_v2  ;;  %v627_v14 = vshll.u32 %v626_v11, 16 }
 0x145   : > { %v635_v4 = vpop.xlane.xlu0 %634 }
 0x146   : > { %vm636_vm3 = vcmp.eq.f32.partialorder %v633_v58, %v635_v4  ;;  %v641_v22 = vcvt.f32.s32 %v635_v4 }
 0x147   : > { %v637_v6 = vsel %vm636_vm3, %v632_v5, inf }
 0x148   : > { %638 = vmin.xlane.f32.xlu1 %v637_v6  ;;  %v642_v28 = vshll.u32 %v641_v22, 16 }
 0x1c6   : > { %v609_v8 = vpop.xlane.xlu1 %608 }
 0x1c7   : > { %v610_v10 = vcvt.f32.s32 %v609_v8 }
 0x1c9   : > { %v1315_v12 = vadd.s32 %v612_v9, %v610_v10 }
 0x1cb   : > { %vm644_vm4 = vcmp.eq.s32.totalorder %v1297_v34, %v1315_v12  ;;  %v624_v13 = vpop.xlane.xlu0 %623 }
 0x1cc   : > { %v625_v15 = vcvt.f32.s32 %v624_v13  ;;  %v1323_v16 = vsel %vm644_vm4, 2147483647, %v1297_v34 }
 0x1cd   : > { %v674_v17 = vsel %vm598_vm0, %v1323_v16, 2147483647 }
 0x1ce   : > { %v1327_v18 = vadd.s32 %v627_v14, %v625_v15  ;;  %v676_v19 = vshra.s32 %v674_v17, 16  ;;  %v675_v37 = vand.u32 65535, %v674_v17 }
 0x1d0   : > { %vm645_vm5 = vcmp.eq.s32.totalorder %v1304_v45, %v1327_v18  ;;  %v678_v20 = vcvt.s32.f32 %v676_v19  ;;  %v677_v39 = vcvt.s32.f32 %v675_v37 }
 0x1d1   : > { %v1335_v21 = vsel %vm645_vm5, 2147483647, %v1304_v45 }
 0x1d2   : > { %679 = vmin.xlane.f32.xlu0 %v678_v20  ;;  %v689_v23 = vsel %vm598_vm0, %v1335_v21, 2147483647 }
 0x1d3   : > { %v691_v24 = vshra.s32 %v689_v23, 16  ;;  %v690_v40 = vand.u32 65535, %v689_v23 }
 0x1d5   : > { %v639_v25 = vpop.xlane.xlu1 %638  ;;  %v693_v27 = vcvt.s32.f32 %v691_v24  ;;  %v692_v43 = vcvt.s32.f32 %v690_v40 }
 0x1d6   : > { %v640_v29 = vcvt.f32.s32 %v639_v25 }
 0x1d7   : > { %694 = vmin.xlane.f32.xlu1 %v693_v27 }
 0x1d8   : > { %v1339_v30 = vadd.s32 %v642_v28, %v640_v29  ;;  %v647_v28 = vsel %vm644_vm4, %v1294_v26, 0.0 }
 0x1d9   : > { %v650_v29 = vsel %vm598_vm0, %v647_v28, 0.0 }
 0x1da   : > { %vm646_vm6 = vcmp.eq.s32.totalorder %v1311_v55, %v1339_v30 }
 0x1db   : > { %v1347_v31 = vsel %vm646_vm6, 2147483647, %v1311_v55 }
 0x1dc   : > { %v704_v32 = vsel %vm598_vm0, %v1347_v31, 2147483647 }
 0x1dd   : > { %v706_v33 = vshra.s32 %v704_v32, 16  ;;  %v705_v46 = vand.u32 65535, %v704_v32 }
 0x1df   : > { %v708_v36 = vcvt.s32.f32 %v706_v33  ;;  %v707_v48 = vcvt.s32.f32 %v705_v46 }
 0x1e1   : > { %709 = vmin.xlane.f32.xlu0 %v708_v36 }
 0x25f   : > { %v680_v38 = vpop.xlane.xlu0 %679 }
 0x260   : > { %vm681_vm7 = vcmp.eq.f32.partialorder %v678_v20, %v680_v38  ;;  %v686_v50 = vcvt.f32.s32 %v680_v38 }
 0x261   : > { %v682_v41 = vsel %vm681_vm7, %v677_v39, inf  ;;  %vm1221_vm7 = vmmov 0  }
 0x262   : > { %683 = vmin.xlane.f32.xlu1 %v682_v41  ;;  %v687_v52 = vshll.u32 %v686_v50, 16 }
 0x264   : > { %v695_v42 = vpop.xlane.xlu1 %694 }
 0x265   : > { %vm696_vm8 = vcmp.eq.f32.partialorder %v693_v27, %v695_v42  ;;  %v701_v56 = vcvt.f32.s32 %v695_v42  ;;  %v648_v42 = vsel %vm645_vm5, %v1299_v35, 0.0 }
 0x266   : > { %v697_v44 = vsel %vm696_vm8, %v692_v43, inf  ;;  %v653_v43 = vsel %vm598_vm0, %v648_v42, 0.0  ;;  %vm393_vm8 = vcmask 130048  }
 0x267   : > { %698 = vmin.xlane.f32.xlu0 %v697_v44  ;;  %v702_v59 = vshll.u32 %v701_v56, 16 }
 0x26e   : > { %v710_v47 = vpop.xlane.xlu0 %709 }
 0x26f   : > { %vm711_vm9 = vcmp.eq.f32.partialorder %v708_v36, %v710_v47  ;;  %v716_v3 = vcvt.f32.s32 %v710_v47 }
 0x270   : > { %v712_v49 = vsel %vm711_vm9, %v707_v48, inf }
 0x271   : > { %713 = vmin.xlane.f32.xlu1 %v712_v49  ;;  %v717_v8 = vshll.u32 %v716_v3, 16 }
 0x2ef   : > { %v684_v51 = vpop.xlane.xlu1 %683 }
 0x2f0   : > { %v685_v54 = vcvt.f32.s32 %v684_v51 }
 0x2f2   : > { %v1351_v57 = vadd.s32 %v687_v52, %v685_v54 }
 0x2f4   : > { %vm719_vm10 = vcmp.eq.s32.totalorder %v1323_v16, %v1351_v57  ;;  %v699_v58 = vpop.xlane.xlu0 %698 }
 0x2f5   : > { %v700_v60 = vcvt.f32.s32 %v699_v58  ;;  %v1359_v61 = vsel %vm719_vm10, 2147483647, %v1323_v16  ;;  %v722_v40 = vsel %vm719_vm10, %v1294_v26, 0.0 }
 0x2f6   : > { %v749_v62 = vsel %vm598_vm0, %v1359_v61, 2147483647  ;;  %v725_v41 = vsel %vm598_vm0, %v722_v40, 0.0 }
 0x2f7   : > { %v1363_v63 = vadd.s32 %v702_v59, %v700_v60  ;;  %v751_v0 = vshra.s32 %v749_v62, 16  ;;  %v750_v17 = vand.u32 65535, %v749_v62  ;;  %v649_v60 = vsel %vm646_vm6, %v1308_v53, 0.0 }
 0x2f8   : > { %v656_v62 = vsel %vm598_vm0, %v649_v60, 0.0 }
 0x2f9   : > { %vm720_vm11 = vcmp.eq.s32.totalorder %v1335_v21, %v1363_v63  ;;  %v753_v1 = vcvt.s32.f32 %v751_v0  ;;  %v752_v20 = vcvt.s32.f32 %v750_v17  ;;  %v1220_v17 = vmov 0.0|0.0  }
 0x2fa   : > { %v1371_v2 = vsel %vm720_vm11, 2147483647, %v1335_v21  ;;  %v723_v33 = vsel %vm720_vm11, %v1299_v35, 0.0  ;;  %1127 = vmatprep.subr.bf16.mxu0 %v1220_v17 }
 0x2fb   : > { %754 = vmin.xlane.f32.xlu0 %v753_v1  ;;  %v764_v4 = vsel %vm598_vm0, %v1371_v2, 2147483647  ;;  %v728_v37 = vsel %vm598_vm0, %v723_v33, 0.0 }
 0x2fc   : > { %v766_v5 = vshra.s32 %v764_v4, 16  ;;  %v765_v22 = vand.u32 65535, %v764_v4 }
 0x2fe   : > { %v714_v6 = vpop.xlane.xlu1 %713  ;;  %v768_v7 = vcvt.s32.f32 %v766_v5  ;;  %v767_v25 = vcvt.s32.f32 %v765_v22  ;;  %v389_v22 = vld [vmem:[%s376_s19 + $0x8] sm:$0xff] }
 0x2ff   : > { %v715_v9 = vcvt.f32.s32 %v714_v6 }
 0x300   : > { %769 = vmin.xlane.f32.xlu1 %v768_v7 }
 0x301   : > { %v1375_v10 = vadd.s32 %v717_v8, %v715_v9 }
 0x303   : > { %vm721_vm12 = vcmp.eq.s32.totalorder %v1347_v31, %v1375_v10 }
 0x304   : > { %v1383_v11 = vsel %vm721_vm12, 2147483647, %v1347_v31  ;;  %v724_v3 = vsel %vm721_vm12, %v1308_v53, 0.0  ;;  %v1084_v31 = vld [vmem:[%s1531_s5] ss:$0 sm:$0xff] }
 0x305   : > { %v779_v13 = vsel %vm598_vm0, %v1383_v11, 2147483647 }
 0x306   : > { %v781_v14 = vshra.s32 %v779_v13, 16  ;;  %v780_v32 = vand.u32 65535, %v779_v13  ;;  %v391_v13 = vld [vmem:[%s1530_s4] sm:$0xff] }
 0x308   : > { %v783_v15 = vcvt.s32.f32 %v781_v14  ;;  %v782_v38 = vcvt.s32.f32 %v780_v32  ;;  %v392_v14 = vld [vmem:[%s1530_s4 + $0x8] sm:$0xff] }
 0x30a   : > { %784 = vmin.xlane.f32.xlu0 %v783_v15 }
 0x388   : > { %v755_v19 = vpop.xlane.xlu0 %754 }
 0x389   : > { %vm756_vm13 = vcmp.eq.f32.partialorder %v753_v1, %v755_v19  ;;  %v761_v44 = vcvt.f32.s32 %v755_v19  ;;  %v388_v19 = vld [vmem:[%s376_s19] sm:$0xff] }
 0x38a   : > { %v757_v23 = vsel %vm756_vm13, %v752_v20, inf  ;;  %v830_v20 = vld [vmem:[%s357_s23] sm:$0xff] }
 0x38b   : > { %758 = vmin.xlane.f32.xlu1 %v757_v23  ;;  %v762_v47 = vshll.u32 %v761_v44, 16  ;;  %v390_v23 = vld [vmem:[%s376_s19 + $0x10] sm:$0xff] }
 0x38d   : > { %v770_v24 = vpop.xlane.xlu1 %769 }
 0x38e   : > { %vm771_vm14 = vcmp.eq.f32.partialorder %v768_v7, %v770_v24  ;;  %v776_v49 = vcvt.f32.s32 %v770_v24  ;;  %v731_v7 = vsel %vm598_vm0, %v724_v3, 0.0 }
 0x38f   : > { %v772_v27 = vsel %vm771_vm14, %v767_v25, inf }
 0x390   : > { %773 = vmin.xlane.f32.xlu0 %v772_v27  ;;  %v777_v52 = vshll.u32 %v776_v49, 16 }
 0x394   : > { %651 = vadd.xlane.f32.xlu0 %v650_v29 }
 0x397   : > { %v785_v36 = vpop.xlane.xlu0 %784 }
 0x398   : > { %729 = vadd.xlane.f32.xlu0 %v728_v37  ;;  %vm786_vm15 = vcmp.eq.f32.partialorder %v783_v15, %v785_v36  ;;  %v791_v0 = vcvt.f32.s32 %v785_v36  ;;  %v1128_v15 = vpack.c.bf16 %v392_v14, %v391_v13 }
 0x399   : > { %v787_v39 = vsel %vm786_vm15, %v782_v38, inf }
 0x39a   : > { %788 = vmin.xlane.f32.xlu1 %v787_v39  ;;  %v792_v5 = vshll.u32 %v791_v0, 16  ;;  %1129 = vmatpush3.bf16.msra.mxu0 %v1128_v15 }
 0x39e   : > { %726 = vadd.xlane.f32.xlu1 %v725_v41 }
 0x3a2   : > { %654 = vadd.xlane.f32.xlu1 %v653_v43 }
 0x418   : > { %v759_v46 = vpop.xlane.xlu1 %758 }
 0x419   : > { %v760_v48 = vcvt.f32.s32 %v759_v46 }
 0x41b   : > { %v1407_v50 = vadd.s32 %v762_v47, %v760_v48 }
 0x41d   : > { %v774_v51 = vpop.xlane.xlu0 %773  ;;  %vm794_vm1 = vcmp.eq.s32.totalorder %v1359_v61, %v1407_v50 }
 0x41e   : > { %v775_v54 = vcvt.f32.s32 %v774_v51  ;;  %v797_v56 = vsel %vm794_vm1, %v1294_v26, 0.0 }
 0x41f   : > { %v800_v58 = vsel %vm598_vm0, %v797_v56, 0.0 }
 0x420   : > { %v1416_v59 = vadd.s32 %v777_v52, %v775_v54  ;;  %801 = vadd.xlane.f32.xlu0 %v800_v58 }
 0x421   : > { %v652_v25 = vpop.xlane.xlu0 %651 }
 0x422   : > { %vm795_vm2 = vcmp.eq.s32.totalorder %v1371_v2, %v1416_v59  ;;  %v659_v27 = vadd.f32 1e-08, %v652_v25 }
 0x423   : > { %v798_v26 = vsel %vm795_vm2, %v1299_v35, 0.0 }
 0x424   : > { %657 = vadd.xlane.f32.xlu0 %v656_v62  ;;  %v803_v1 = vsel %vm598_vm0, %v798_v26, 0.0  ;;  %1169 = vrcp.f32 %v659_v27 }
 0x425   : > { %804 = vadd.xlane.f32.xlu1 %v803_v1  ;;  %v730_v29 = vpop.xlane.xlu0 %729 }
 0x426   : > { %v735_v38 = vadd.f32 1e-08, %v730_v29 }
 0x427   : > { %v789_v4 = vpop.xlane.xlu1 %788 }
 0x428   : > { %v790_v6 = vcvt.f32.s32 %v789_v4 }
 0x429   : > { %732 = vadd.xlane.f32.xlu1 %v731_v7 }
 0x42a   : > { %v1435_v8 = vadd.s32 %v792_v5, %v790_v6  ;;  %v1085_v5 = vld [vmem:[%s1532_s6] ss:$0 sm:$0xff] }
 0x42b   : > { %v727_v24 = vpop.xlane.xlu1 %726 }
 0x42c   : > { %vm796_vm3 = vcmp.eq.s32.totalorder %v1383_v11, %v1435_v8  ;;  %v734_v32 = vadd.f32 1e-08, %v727_v24 }
 0x42d   : > { %v799_v35 = vsel %vm796_vm3, %v1308_v53, 0.0  ;;  %v1222_v53 = vmov 0.0  }
 0x42e   : > { %v806_v9 = vsel %vm598_vm0, %v799_v35, 0.0  ;;  %1107 = vmatprep.mubr.msk.f32.mxu0 %vm1221_vm7, %v1222_v53  ;;  %1116 = vmatprep.subr.mxu1 %v1222_v53  ;;  %1171 = vrcp.f32 %v734_v32  ;;  %v1170_v42 = vpop.eup %1169 }
 0x42f   : > { %807 = vadd.xlane.f32.xlu0 %v806_v9  ;;  %1108 = vmatmul.mubr.msk.f32.vlgmr.msra.gmra.mrb[0].mxu0 %vm393_vm8, %v388_v19  ;;  %v655_v28 = vpop.xlane.xlu1 %654  ;;  %v668_v49 = vsel %vm644_vm4, %v1170_v42, 0.0 }
 0x430   : > { %1118 = vmatprep.mubr.msk.f32.mxu1 %vm1221_vm7, %v1222_v53  ;;  %1110 = vmatprep.mubr.msk.f32.mxu0 %vm1221_vm7, %v1222_v53  ;;  %v660_v33 = vadd.f32 1e-08, %v655_v28 }
 0x431   : > { %1117 = vmatpush3.msra.mxu1 %v830_v20 }
 0x432   : > { %1173 = vrcp.f32 %v660_v33 }
 0x433   : > { %1111 = vmatmul.mubr.msk.f32.gmra.mrb[2].mxu0 %vm393_vm8, %v389_v22 }
 0x434   : > { %1113 = vmatprep.mubr.msk.f32.mxu0 %vm1221_vm7, %v1222_v53 }
 0x437   : > { %1114 = vmatmul.mubr.msk.f32.gmra.mrb[4].mxu0 %vm393_vm8, %v390_v23 }
 0x438   : > { %v1172_v44 = vpop.eup %1171 }
 0x439   : > { %v743_v52 = vsel %vm719_vm10, %v1172_v44, %v668_v49 }
 0x43c   : > { %v1174_v48 = vpop.eup %1173 }
 0x43d   : > { %v669_v34 = vsel %vm645_vm5, %v1174_v48, 0.0 }
 0x4ad   : > { %v802_v36 = vpop.xlane.xlu0 %801 }
 0x4ae   : > { %v809_v37 = vadd.f32 1e-08, %v802_v36 }
 0x4b0   : > { %1175 = vrcp.f32 %v809_v37 }
 0x4b1   : > { %1177 = vrcp.f32 %v735_v38  ;;  %v658_v41 = vpop.xlane.xlu0 %657 }
 0x4b2   : > { %v805_v39 = vpop.xlane.xlu1 %804  ;;  %v661_v46 = vadd.f32 1e-08, %v658_v41 }
 0x4b3   : > { %v810_v40 = vadd.f32 1e-08, %v805_v39 }
 0x4b5   : > { %1179 = vrcp.f32 %v810_v40 }
 0x4b6   : > { %v733_v43 = vpop.xlane.xlu1 %732  ;;  %1181 = vrcp.f32 %v661_v46 }
 0x4b7   : > { %v736_v47 = vadd.f32 1e-08, %v733_v43 }
 0x4b9   : > { %1183 = vrcp.f32 %v736_v47 }
 0x4ba   : > { %v1176_v51 = vpop.eup %1175 }
 0x4bb   : > { %v818_v54 = vsel %vm794_vm1, %v1176_v51, %v743_v52  ;;  %v1178_v16 = vpop.eup %1177 }
 0x4bc   : > { %v808_v56 = vpop.xlane.xlu0 %807  ;;  %1119 = vmatmul.mubr.msk.f32.vlgmr.msra.gmra.mrb[0].mxu1 %vm598_vm0, %v818_v54  ;;  %v821_v58 = vsel %vm598_vm0, %v818_v54, 0.0  ;;  %v744_v61 = vsel %vm720_vm11, %v1178_v16, %v669_v34 }
 0x4bd   : > { %v811_v12 = vadd.f32 1e-08, %v808_v56  ;;  %822 = vadd.xlane.f32.xlu1 %v821_v58  ;;  %1121 = vmatprep.mubr.msk.f32.mxu1 %vm1221_vm7, %v1222_v53 }
 0x4bf   : > { %v1180_v57 = vpop.eup %1179  ;;  %1185 = vrcp.f32 %v811_v12 }
 0x4c0   : > { %v819_v50 = vsel %vm795_vm2, %v1180_v57, %v744_v61  ;;  %v1182_v18 = vpop.eup %1181 }
 0x4c1   : > { %1122 = vmatmul.mubr.msk.f32.gmra.mrb[2].mxu1 %vm598_vm0, %v819_v50  ;;  %v824_v45 = vsel %vm598_vm0, %v819_v50, 0.0  ;;  %v670_v62 = vsel %vm646_vm6, %v1182_v18, 0.0 }
 0x4c2   : > { %825 = vadd.xlane.f32.xlu0 %v824_v45  ;;  %1124 = vmatprep.mubr.msk.f32.mxu1 %vm1221_vm7, %v1222_v53 }
 0x4c3   : > { %v1184_v60 = vpop.eup %1183 }
 0x4c4   : > { %v745_v63 = vsel %vm721_vm12, %v1184_v60, %v670_v62 }
 0x4c9   : > { %v1186_v21 = vpop.eup %1185 }
 0x4ca   : > { %v820_v2 = vsel %vm796_vm3, %v1186_v21, %v745_v63 }
 0x4cb   : > { %1125 = vmatmul.mubr.msk.f32.gmra.mrb[4].mxu1 %vm598_vm0, %v820_v2  ;;  %v827_v59 = vsel %vm598_vm0, %v820_v2, 0.0  ;;  %vm932_vm0 = vcmask 261120  }
 0x4cc   : > { %828 = vadd.xlane.f32.xlu1 %v827_v59 }
 0x502   : > { %v469_v26 = vpop.f32.mrb[0].mxu0 }
 0x503   : > { %v1109_v0 = vpop.f32.mrb[1].mxu0  ;;  %v490_v10 = vmul.f32 %v1084_v31, %v469_v26 }
 0x505   : > { %v500_v6 = vadd.f32 %v1085_v5, %v490_v10 }
 0x506   : > { %v474_v1 = vpop.f32.mrb[2].mxu0 }
 0x507   : > { %v1112_v3 = vpop.f32.mrb[3].mxu0  ;;  %v491_v7 = vmul.f32 %v1084_v31, %v474_v1  ;;  %v503_v8 = vmax.f32 %v500_v6, 0.0 }
 0x509   : > { %v501_v13 = vadd.f32 %v1085_v5, %v491_v7 }
 0x50a   : > { %v479_v55 = vpop.f32.mrb[4].mxu0 }
 0x50b   : > { %v1115_v30 = vpop.f32.mrb[5].mxu0  ;;  %v504_v19 = vmax.f32 %v501_v13, 0.0  ;;  %v492_v25 = vmul.f32 %v1084_v31, %v479_v55 }
 0x50d   : > { %v502_v28 = vadd.f32 %v1085_v5, %v492_v25 }
 0x50f   : > { %v505_v29 = vmax.f32 %v502_v28, 0.0 }
 0x54a   : > { %v823_v4 = vpop.xlane.xlu1 %822 }
 0x54b   : > { %1187 = vrcp.f32 %v823_v4 }
 0x54f   : > { %v826_v11 = vpop.xlane.xlu0 %825 }
 0x550   : > { %1189 = vrcp.f32 %v826_v11 }
 0x555   : > { %v1188_v35 = vpop.eup %1187 }
 0x559   : > { %v829_v17 = vpop.xlane.xlu1 %828 }
 0x55a   : > { %v1190_v20 = vpop.eup %1189  ;;  %1191 = vrcp.f32 %v829_v17 }
 0x564   : > { %v1192_v32 = vpop.eup %1191 }
 0x58f   : > { %v906_v9 = vpop.f32.mrb[0].mxu1 }
 0x590   : > { %v926_v14 = vmul.f32 %v1188_v35, %v906_v9  ;;  %v1120_v15 = vpop.f32.mrb[1].mxu1 }
 0x592   : > { %v929_v53 = vadd.f32 %v926_v14, %v503_v8 }
 0x594   : > { %933 = vst.msk [vmem:[%s386_s11] sm:$0xff] %vm932_vm0, %v929_v53  ;;  %v911_v22 = vpop.f32.mrb[2].mxu1 }
 0x595   : > { %v927_v23 = vmul.f32 %v1190_v20, %v911_v22  ;;  %v1123_v24 = vpop.f32.mrb[3].mxu1 }
 0x597   : > { %v930_v27 = vadd.f32 %v927_v23, %v504_v19 }
 0x599   : > { %934 = vst.msk [vmem:[%s386_s11 + $0x8] sm:$0xff] %vm932_vm0, %v930_v27 }
 0x59e   : > { %v916_v33 = vpop.f32.mrb[4].mxu1 }
 0x59f   : > { %v928_v36 = vmul.f32 %v1192_v32, %v916_v33  ;;  %v1126_v37 = vpop.f32.mrb[5].mxu1 }
 0x5a1   : > { %v931_v38 = vadd.f32 %v928_v36, %v505_v29 }
 0x5a3   : > { %935 = vst.msk [vmem:[%s386_s11 + $0x10] sm:$0xff] %vm932_vm0, %v931_v38 }
 0x5a4 PF: > { %s17_s26 = sadd.s32 1, %s1215_s26   ;;  %s1534_s24 = smov %s1211_s25 }
 0x5a5   : > { %p14_p5 = scmp.ge.s32.totalorder %s17_s26, 4   ;;  %s1535_s25 = smov %s1537_s27 }
 0x5a7   :  { %16 = sbr.rel (!%p14_p5) target bundleno = 2 (0x2), region = 87 }

</bundles_post_ra>
